<compile_context>
chip_gen: v7x
topology: tpu7x:2x2x1
jax: 0.10.0
libtpu: 0.0.40
codegen_flags: <defaults>
</compile_context>

<pallas_src>
import functools

import numpy as np
import jax
import jax.numpy as jnp
from jax import lax
from jax.experimental import pallas as pl
from jax.experimental.pallas import tpu as pltpu


def _sigmoid(z):
    return 1.0 / (1.0 + jnp.exp(-z))


def _pbcsa_kernel(x_ref, mask_ref, wmat_ref, out_ref, tap_ref, *,
                  mid, C, shifts, use_res, b_blk, rows):
    R_W1, R_W0, R_WD1, R_WD2, R_COLS, R_W2 = rows

    # ---- hoisted parameter loads (single lane-dense block, static 8-aligned slices) ----
    w1 = wmat_ref[R_W1:R_W1 + mid, :]                    # (mid, C)   SE reduce weight
    w0 = wmat_ref[R_W0:R_W0 + mid, :]                    # (mid, C)   spatial 1x1 reduce
    wd1 = wmat_ref[R_WD1:R_WD1 + mid, :][:, :9 * mid]    # (mid, 9*mid) dilated conv 1
    wd2 = wmat_ref[R_WD2:R_WD2 + mid, :][:, :9 * mid]    # (mid, 9*mid) dilated conv 2
    cols = wmat_ref[R_COLS:R_COLS + mid, :]
    b1 = cols[:, 0:1]                                    # (mid, 1)  SE bias 1
    w3c = cols[:, 1:2]                                   # (mid, 1)  1x1->1 conv * bn_scale
    bnb = cols[0:1, 2:3]                                 # (1, 1)    folded BN bias
    w2b = wmat_ref[R_W2:R_W2 + C, :]
    w2 = w2b[:, 0:mid]                                   # (C, mid)  SE expand weight
    b2 = w2b[:, mid:mid + 1]                             # (C, 1)    SE bias 2

    masks = mask_ref[...]                                # (9, HW) tap validity masks
    mask_rows = [masks[t:t + 1, :] for t in range(9)]

    def sig_exp(z):
        # exp(sigmoid(z)); approx reciprocal keeps the divide on the EUP slot.
        return jnp.exp(pl.reciprocal(1.0 + jnp.exp(-z), approx=True))

    def dilated_conv3x3(feat, w_flat):
        # feat: (mid, HW).  9 rolled + boundary-masked taps -> VMEM scratch (static
        # sublane slices, no concatenate), then one (mid, 9*mid) @ (9*mid, HW) matmul.
        for t, s in enumerate(shifts):
            shifted = feat if s == 0 else pltpu.roll(feat, shift=s, axis=1)
            tap_ref[t * mid:(t + 1) * mid, :] = shifted * mask_rows[t]
        return jnp.dot(w_flat, tap_ref[...], preferred_element_type=jnp.float32)

    for b in range(b_blk):
        xi = x_ref[b].astype(jnp.float32)                # (C, HW)

        # ---- channel attention: SE block on (avg_pool + max_pool), column layout ----
        v = jnp.mean(xi, axis=1, keepdims=True) + jnp.max(xi, axis=1, keepdims=True)
        h = jnp.dot(w1, v, preferred_element_type=jnp.float32) + b1     # (mid, 1)
        h = jnp.maximum(h, 0.0)
        z = jnp.dot(w2, h, preferred_element_type=jnp.float32) + b2     # (C, 1)
        ch_gate = sig_exp(z)                             # (C, 1): broadcasts over lanes

        # ---- spatial attention, lane-dense (mid, HW) ----
        f = jnp.dot(w0, xi, preferred_element_type=jnp.float32)         # (mid, HW)
        f = dilated_conv3x3(f, wd1)
        f = dilated_conv3x3(f, wd2)
        # 1x1 conv to 1 channel + folded BatchNorm, kept lane-dense as a (1, HW) row.
        logit = jnp.sum(f * w3c, axis=0, keepdims=True) + bnb           # (1, HW)
        sp_gate = sig_exp(logit)                         # (1, HW): broadcasts over sublanes

        # Fused gating: out = x * (ch + sp [+ 1])
        gate = ch_gate + sp_gate                         # (C, HW) via 2-sided broadcast
        if use_res:
            gate = gate + 1.0
        out_ref[b] = (xi * gate).astype(out_ref.dtype)


def _make_tap_tables(H, W, dilation):
    """Static per-tap lane shifts + (9, HW) 0/1 validity masks for a dilated 3x3."""
    HW = H * W
    masks = np.zeros((9, HW), np.float32)
    shifts = []
    hh = np.arange(H)[:, None]
    ww = np.arange(W)[None, :]
    for ky in range(3):
        for kx in range(3):
            oy, ox = (ky - 1) * dilation, (kx - 1) * dilation
            offset = oy * W + ox
            shifts.append(int((-offset) % HW))           # jnp.roll semantics
            valid = ((hh + oy >= 0) & (hh + oy < H) & (ww + ox >= 0) & (ww + ox < W))
            masks[ky * 3 + kx] = valid.astype(np.float32).reshape(HW)
    return jnp.asarray(masks), tuple(shifts)


def _pick_batch_block(N, bytes_per_image, target_bytes=512 * 1024,
                      vmem_cap_bytes=4 * 1024 * 1024):
    """Largest divisor of N that keeps >=2 grid steps (megacore + pipelining) while
    aiming at ~target_bytes of x per step and a modest VMEM footprint (v7x: 64 MiB)."""
    want = max(1, min(N, target_bytes // max(1, bytes_per_image)))
    want = max(1, min(want, vmem_cap_bytes // max(1, bytes_per_image)))
    best = 1
    for b in range(1, N + 1):
        if N % b:
            continue
        if b <= want and (N // b >= 2 or N == 1):
            best = b
    return best


def pbcsa_forward(x_nchw, params, *, dilation=4, use_res=True):
    N, C, H, W = x_nchw.shape
    mid = params['se_w1'].shape[0]
    HW = H * W
    if C % 128 != 0 or HW % 128 != 0:
        raise ValueError("kernel assumes lane-dense C and H*W (multiples of 128)")
    if 9 * mid > C:
        raise ValueError("dilated-conv tap weights must fit in C lanes (9*mid <= C)")

    def r8(n):
        return ((n + 7) // 8) * 8

    midp = r8(mid)
    R_W1, R_W0, R_WD1, R_WD2, R_COLS, R_W2 = (0, midp, 2 * midp, 3 * midp,
                                              4 * midp, 5 * midp)
    ROWS = R_W2 + r8(C)

    def flat_taps(w):                                    # (out,in,3,3) -> (out, 9*in)
        return jnp.transpose(w, (0, 2, 3, 1)).reshape(w.shape[0], 9 * w.shape[1])

    # TODO(synk): BatchNorm2d is applied in eval mode with its running stats;
    # training-mode batch statistics are not computed in the kernel.
    bn_scale = params['bn_gamma'] / jnp.sqrt(params['bn_var'] + params['bn_eps'])  # (1,)
    bn_bias = params['bn_beta'] - params['bn_mean'] * bn_scale                      # (1,)
    w3_folded = params['sp_w3'][:, :, 0, 0] * bn_scale[0]                           # (1, mid)

    # Pack ALL parameters into one lane-dense (ROWS, C) block: one contiguous DMA,
    # no lane-sparse (C, mid) blocks (se_w2 and its bias are pre-padded into C lanes).
    wmat = jnp.zeros((ROWS, C), jnp.float32)
    wmat = wmat.at[R_W1:R_W1 + mid, :].set(params['se_w1'])
    wmat = wmat.at[R_W0:R_W0 + mid, :].set(params['sp_w0'])
    wmat = wmat.at[R_WD1:R_WD1 + mid, :9 * mid].set(flat_taps(params['sp_wd1']))
    wmat = wmat.at[R_WD2:R_WD2 + mid, :9 * mid].set(flat_taps(params['sp_wd2']))
    wmat = wmat.at[R_COLS:R_COLS + mid, 0].set(params['se_b1'])
    wmat = wmat.at[R_COLS:R_COLS + mid, 1].set(w3_folded[0])
    wmat = wmat.at[R_COLS, 2].set(bn_bias[0])
    wmat = wmat.at[R_W2:R_W2 + C, :mid].set(params['se_w2'])
    wmat = wmat.at[R_W2:R_W2 + C, mid].set(params['se_b2'])

    masks, shifts = _make_tap_tables(H, W, dilation)     # (9, HW), static shifts

    # NCHW -> (N, C, HW): pure reshape, NO transpose (key HBM-traffic fix).
    x = x_nchw.reshape(N, C, HW)

    bytes_per_image = C * HW * x.dtype.itemsize
    b_blk = _pick_batch_block(N, bytes_per_image)

    kernel = functools.partial(
        _pbcsa_kernel, mid=mid, C=C, shifts=shifts, use_res=use_res, b_blk=b_blk,
        rows=(R_W1, R_W0, R_WD1, R_WD2, R_COLS, R_W2))

    out = pl.pallas_call(
        kernel,
        out_shape=jax.ShapeDtypeStruct((N, C, HW), x.dtype),
        grid_spec=pltpu.PrefetchScalarGridSpec(
            num_scalar_prefetch=0,
            grid=(N // b_blk,),
            in_specs=[
                pl.BlockSpec((b_blk, C, HW), lambda n: (n, 0, 0)),   # x block
                pl.BlockSpec((9, HW), lambda n: (0, 0)),             # tap validity masks
                pl.BlockSpec((ROWS, C), lambda n: (0, 0)),           # packed parameters
            ],
            out_specs=pl.BlockSpec((b_blk, C, HW), lambda n: (n, 0, 0)),
            scratch_shapes=[pltpu.VMEM((9 * mid, HW), jnp.float32)],  # conv tap scratch
        ),
        compiler_params=pltpu.CompilerParams(
            dimension_semantics=("parallel",),   # batch blocks are independent
        ),
    )(x, masks, wmat)

    return out.reshape(N, C, H, W)               # pure reshape, NO transpose


def init_params(key, C, reduct_ratio=16):
    """Deterministic synthetic parameters matching PBCSABlock.__init__ shapes."""
    mid = C // reduct_ratio
    ks = jax.random.split(key, 8)
    s = 0.1
    p = {
        'se_w1': jax.random.normal(ks[0], (mid, C), jnp.float32) * s,      # Conv2d(C,mid,1)
        'se_b1': jax.random.normal(ks[1], (mid,), jnp.float32) * s,
        'se_w2': jax.random.normal(ks[2], (C, mid), jnp.float32) * s,      # Conv2d(mid,C,1)
        'se_b2': jax.random.normal(ks[3], (C,), jnp.float32) * s,
        'sp_w0': jax.random.normal(ks[4], (mid, C), jnp.float32) * s,      # Conv2d(C,mid,1,bias=False)
        'sp_wd1': jax.random.normal(ks[5], (mid, mid, 3, 3), jnp.float32) * s,
        'sp_wd2': jax.random.normal(ks[6], (mid, mid, 3, 3), jnp.float32) * s,
        'sp_w3': jax.random.normal(ks[7], (1, mid, 1, 1), jnp.float32) * s,  # Conv2d(mid,1,1,bias=False)
        # BatchNorm2d(1) defaults
        'bn_gamma': jnp.ones((1,), jnp.float32),
        'bn_beta': jnp.zeros((1,), jnp.float32),
        'bn_mean': jnp.zeros((1,), jnp.float32),
        'bn_var': jnp.ones((1,), jnp.float32),
        'bn_eps': 1e-5,
    }
    return p


def pbcsa_reference(x, params, *, dilation=4, use_res=True):
    """Pure-JAX (XLA) reference mirroring the PyTorch forward, NCHW layout."""
    hp = jax.lax.Precision.HIGHEST
    avg = jnp.mean(x, axis=(2, 3), keepdims=True)
    mx = jnp.max(x, axis=(2, 3), keepdims=True)
    v = avg + mx
    h = jnp.einsum('nchw,mc->nmhw', v, params['se_w1'], precision=hp) \
        + params['se_b1'].reshape(1, -1, 1, 1)
    h = jnp.maximum(h, 0.0)
    z = jnp.einsum('nmhw,cm->nchw', h, params['se_w2'], precision=hp) \
        + params['se_b2'].reshape(1, -1, 1, 1)
    ch_att = x * jnp.exp(_sigmoid(z))

    f = jnp.einsum('nchw,mc->nmhw', x, params['sp_w0'], precision=hp)
    dn = ('NCHW', 'OIHW', 'NCHW')
    pad = [(dilation, dilation), (dilation, dilation)]
    f = lax.conv_general_dilated(f, params['sp_wd1'], (1, 1), pad,
                                 rhs_dilation=(dilation, dilation),
                                 dimension_numbers=dn, precision=hp)
    f = lax.conv_general_dilated(f, params['sp_wd2'], (1, 1), pad,
                                 rhs_dilation=(dilation, dilation),
                                 dimension_numbers=dn, precision=hp)
    logit = jnp.einsum('nmhw,om->nohw', f, params['sp_w3'][:, :, 0, 0], precision=hp)
    scale = params['bn_gamma'] / jnp.sqrt(params['bn_var'] + params['bn_eps'])
    bias = params['bn_beta'] - params['bn_mean'] * scale
    logit = logit * scale.reshape(1, -1, 1, 1) + bias.reshape(1, -1, 1, 1)
    sp_att = x * jnp.exp(_sigmoid(logit))
    out = sp_att + ch_att
    if use_res:
        out = out + x
    return out


if __name__ == "__main__":
    key = jax.random.PRNGKey(0)
    k_x, k_p = jax.random.split(key)

    N, C, H, W = 2, 128, 16, 16
    reduct_ratio, dilation = 16, 4

    x = jax.random.normal(k_x, (N, C, H, W), jnp.float32)
    params = init_params(k_p, C, reduct_ratio)

    out = jax.block_until_ready(pbcsa_forward(x, params, dilation=dilation, use_res=True))
    ref = jax.block_until_ready(pbcsa_reference(x, params, dilation=dilation, use_res=True))

    assert out.shape == x.shape and out.dtype == x.dtype
    max_err = float(jnp.max(jnp.abs(out - ref)))
    if not np.allclose(np.asarray(out), np.asarray(ref), rtol=5e-2, atol=5e-2):
        raise AssertionError(f"kernel/reference mismatch, max abs err = {max_err}")
    print("KERNEL_OK")
</pallas_src>

<mosaic_0001>
module attributes {stable_mosaic.version = 11 : i64} {
  func.func @_pbcsa_kernel(%arg0: i32, %arg1: memref<1x128x256xf32, #tpu.memory_space<vmem>>, %arg2: memref<9x256xf32, #tpu.memory_space<vmem>>, %arg3: memref<168x128xf32, #tpu.memory_space<vmem>>, %arg4: memref<1x128x256xf32, #tpu.memory_space<vmem>>, %arg5: memref<72x256xf32, #tpu.memory_space<vmem>>) attributes {dimension_semantics = [#tpu.dimension_semantics<parallel>], iteration_bounds = array<i64: 2>, scalar_prefetch = 0 : i64, scratch_operands = 1 : i64, tpu.core_type = #tpu.core_type<tc>, window_params = [{transform_indices = @transform_0, window_bounds = array<i64: 1, 128, 256>}, {pipeline_mode = #tpu.pipeline_mode<synchronous>, transform_indices = @transform_1, window_bounds = array<i64: 9, 256>}, {pipeline_mode = #tpu.pipeline_mode<synchronous>, transform_indices = @transform_2, window_bounds = array<i64: 168, 128>}, {transform_indices = @transform_3, window_bounds = array<i64: 1, 128, 256>}]} {
    %c0 = arith.constant 0 : index
    %c0_0 = arith.constant 0 : index
    %0 = vector.load %arg3[%c0, %c0_0] : memref<168x128xf32, #tpu.memory_space<vmem>>, vector<8x128xf32>
    %c8 = arith.constant 8 : index
    %c0_1 = arith.constant 0 : index
    %1 = vector.load %arg3[%c8, %c0_1] : memref<168x128xf32, #tpu.memory_space<vmem>>, vector<8x128xf32>
    %c16 = arith.constant 16 : index
    %c0_2 = arith.constant 0 : index
    %2 = vector.load %arg3[%c16, %c0_2] : memref<168x128xf32, #tpu.memory_space<vmem>>, vector<8x128xf32>
    %3 = vector.extract_strided_slice %2 {offsets = [0, 0], sizes = [8, 72], strides = [1, 1]} : vector<8x128xf32> to vector<8x72xf32>
    %c24 = arith.constant 24 : index
    %c0_3 = arith.constant 0 : index
    %4 = vector.load %arg3[%c24, %c0_3] : memref<168x128xf32, #tpu.memory_space<vmem>>, vector<8x128xf32>
    %5 = vector.extract_strided_slice %4 {offsets = [0, 0], sizes = [8, 72], strides = [1, 1]} : vector<8x128xf32> to vector<8x72xf32>
    %c32 = arith.constant 32 : index
    %c0_4 = arith.constant 0 : index
    %6 = vector.load %arg3[%c32, %c0_4] : memref<168x128xf32, #tpu.memory_space<vmem>>, vector<8x128xf32>
    %7 = vector.extract_strided_slice %6 {offsets = [0, 0], sizes = [8, 1], strides = [1, 1]} : vector<8x128xf32> to vector<8x1xf32>
    %8 = vector.extract_strided_slice %6 {offsets = [0, 1], sizes = [8, 1], strides = [1, 1]} : vector<8x128xf32> to vector<8x1xf32>
    %9 = vector.extract_strided_slice %6 {offsets = [0, 2], sizes = [1, 1], strides = [1, 1]} : vector<8x128xf32> to vector<1x1xf32>
    %c40 = arith.constant 40 : index
    %c0_5 = arith.constant 0 : index
    %10 = vector.load %arg3[%c40, %c0_5] : memref<168x128xf32, #tpu.memory_space<vmem>>, vector<128x128xf32>
    %11 = vector.extract_strided_slice %10 {offsets = [0, 0], sizes = [128, 8], strides = [1, 1]} : vector<128x128xf32> to vector<128x8xf32>
    %12 = vector.extract_strided_slice %10 {offsets = [0, 8], sizes = [128, 1], strides = [1, 1]} : vector<128x128xf32> to vector<128x1xf32>
    %c0_6 = arith.constant 0 : index
    %c0_7 = arith.constant 0 : index
    %13 = vector.load %arg2[%c0_6, %c0_7] : memref<9x256xf32, #tpu.memory_space<vmem>>, vector<9x256xf32>
    %14 = vector.extract_strided_slice %13 {offsets = [0, 0], sizes = [1, 256], strides = [1, 1]} : vector<9x256xf32> to vector<1x256xf32>
    %15 = vector.extract_strided_slice %13 {offsets = [1, 0], sizes = [1, 256], strides = [1, 1]} : vector<9x256xf32> to vector<1x256xf32>
    %16 = vector.extract_strided_slice %13 {offsets = [2, 0], sizes = [1, 256], strides = [1, 1]} : vector<9x256xf32> to vector<1x256xf32>
    %17 = vector.extract_strided_slice %13 {offsets = [3, 0], sizes = [1, 256], strides = [1, 1]} : vector<9x256xf32> to vector<1x256xf32>
    %18 = vector.extract_strided_slice %13 {offsets = [4, 0], sizes = [1, 256], strides = [1, 1]} : vector<9x256xf32> to vector<1x256xf32>
    %19 = vector.extract_strided_slice %13 {offsets = [5, 0], sizes = [1, 256], strides = [1, 1]} : vector<9x256xf32> to vector<1x256xf32>
    %20 = vector.extract_strided_slice %13 {offsets = [6, 0], sizes = [1, 256], strides = [1, 1]} : vector<9x256xf32> to vector<1x256xf32>
    %21 = vector.extract_strided_slice %13 {offsets = [7, 0], sizes = [1, 256], strides = [1, 1]} : vector<9x256xf32> to vector<1x256xf32>
    %22 = vector.extract_strided_slice %13 {offsets = [8, 0], sizes = [1, 256], strides = [1, 1]} : vector<9x256xf32> to vector<1x256xf32>
    %c0_8 = arith.constant 0 : index
    %c0_9 = arith.constant 0 : index
    %c0_10 = arith.constant 0 : index
    %23 = vector.load %arg1[%c0_8, %c0_9, %c0_10] : memref<1x128x256xf32, #tpu.memory_space<vmem>>, vector<1x128x256xf32>
    %24 = vector.shape_cast %23 : vector<1x128x256xf32> to vector<128x256xf32>
    %cst = arith.constant dense<0.000000e+00> : vector<128xf32>
    %25 = vector.multi_reduction <add>, %24, %cst [1] : vector<128x256xf32> to vector<128xf32>
    %26 = vector.shape_cast %25 : vector<128xf32> to vector<128x1xf32>
    %cst_11 = arith.constant 2.560000e+02 : f32
    %27 = vector.broadcast %cst_11 : f32 to vector<128x1xf32>
    %28 = arith.divf %26, %27 : vector<128x1xf32>
    %cst_12 = arith.constant dense<0xFF800000> : vector<128xf32>
    %29 = vector.multi_reduction <maximumf>, %24, %cst_12 [1] : vector<128x256xf32> to vector<128xf32>
    %30 = vector.shape_cast %29 : vector<128xf32> to vector<128x1xf32>
    %31 = arith.addf %28, %30 : vector<128x1xf32>
    %cst_13 = arith.constant dense<0.000000e+00> : vector<8x1xf32>
    %32 = tpu.matmul %0, %31, %cst_13 {dimension_numbers = #tpu.dot_dimension_numbers<[1], [0], [0], [1], [0, 0, 1, 1], [], []>} : vector<8x128xf32>, vector<128x1xf32>, vector<8x1xf32> -> vector<8x1xf32>
    %33 = arith.addf %32, %7 : vector<8x1xf32>
    %cst_14 = arith.constant 0.000000e+00 : f32
    %34 = vector.broadcast %cst_14 : f32 to vector<8x1xf32>
    %35 = arith.maximumf %33, %34 : vector<8x1xf32>
    %cst_15 = arith.constant dense<0.000000e+00> : vector<128x1xf32>
    %36 = tpu.matmul %11, %35, %cst_15 {dimension_numbers = #tpu.dot_dimension_numbers<[1], [0], [0], [1], [0, 0, 1, 1], [], []>} : vector<128x8xf32>, vector<8x1xf32>, vector<128x1xf32> -> vector<128x1xf32>
    %37 = arith.addf %36, %12 : vector<128x1xf32>
    %cst_16 = arith.constant 0.000000e+00 : f32
    %38 = vector.broadcast %cst_16 : f32 to vector<128x1xf32>
    %39 = arith.subf %38, %37 : vector<128x1xf32>
    %40 = math.exp %39 : vector<128x1xf32>
    %cst_17 = arith.constant 1.000000e+00 : f32
    %41 = vector.broadcast %cst_17 : f32 to vector<128x1xf32>
    %42 = arith.addf %41, %40 : vector<128x1xf32>
    %43 = tpu.reciprocal %42 {approx = true} : vector<128x1xf32> -> vector<128x1xf32>
    %44 = math.exp %43 : vector<128x1xf32>
    %cst_18 = arith.constant dense<0.000000e+00> : vector<8x256xf32>
    %45 = tpu.matmul %1, %24, %cst_18 {dimension_numbers = #tpu.dot_dimension_numbers<[1], [0], [0], [1], [0, 0, 1, 1], [], []>} : vector<8x128xf32>, vector<128x256xf32>, vector<8x256xf32> -> vector<8x256xf32>
    %c68_i32 = arith.constant 68 : i32
    %46 = tpu.dynamic_rotate %45 by %c68_i32 dim 1 : vector<8x256xf32>, i32 -> vector<8x256xf32>
    %47 = vector.broadcast %14 : vector<1x256xf32> to vector<8x256xf32>
    %48 = arith.mulf %46, %47 : vector<8x256xf32>
    %c0_19 = arith.constant 0 : index
    %c0_20 = arith.constant 0 : index
    %49 = vector.load %arg5[%c0_19, %c0_20] : memref<72x256xf32, #tpu.memory_space<vmem>>, vector<8x256xf32>
    tpu.vector_store %arg5[%c0_19, %c0_20], %48 {strides = array<i32>} : memref<72x256xf32, #tpu.memory_space<vmem>>, vector<8x256xf32>,
    %c64_i32 = arith.constant 64 : i32
    %50 = tpu.dynamic_rotate %45 by %c64_i32 dim 1 : vector<8x256xf32>, i32 -> vector<8x256xf32>
    %51 = vector.broadcast %15 : vector<1x256xf32> to vector<8x256xf32>
    %52 = arith.mulf %50, %51 : vector<8x256xf32>
    %c8_21 = arith.constant 8 : index
    %c0_22 = arith.constant 0 : index
    %53 = vector.load %arg5[%c8_21, %c0_22] : memref<72x256xf32, #tpu.memory_space<vmem>>, vector<8x256xf32>
    tpu.vector_store %arg5[%c8_21, %c0_22], %52 {strides = array<i32>} : memref<72x256xf32, #tpu.memory_space<vmem>>, vector<8x256xf32>,
    %c60_i32 = arith.constant 60 : i32
    %54 = tpu.dynamic_rotate %45 by %c60_i32 dim 1 : vector<8x256xf32>, i32 -> vector<8x256xf32>
    %55 = vector.broadcast %16 : vector<1x256xf32> to vector<8x256xf32>
    %56 = arith.mulf %54, %55 : vector<8x256xf32>
    %c16_23 = arith.constant 16 : index
    %c0_24 = arith.constant 0 : index
    %57 = vector.load %arg5[%c16_23, %c0_24] : memref<72x256xf32, #tpu.memory_space<vmem>>, vector<8x256xf32>
    tpu.vector_store %arg5[%c16_23, %c0_24], %56 {strides = array<i32>} : memref<72x256xf32, #tpu.memory_space<vmem>>, vector<8x256xf32>,
    %c4_i32 = arith.constant 4 : i32
    %58 = tpu.dynamic_rotate %45 by %c4_i32 dim 1 : vector<8x256xf32>, i32 -> vector<8x256xf32>
    %59 = vector.broadcast %17 : vector<1x256xf32> to vector<8x256xf32>
    %60 = arith.mulf %58, %59 : vector<8x256xf32>
    %c24_25 = arith.constant 24 : index
    %c0_26 = arith.constant 0 : index
    %61 = vector.load %arg5[%c24_25, %c0_26] : memref<72x256xf32, #tpu.memory_space<vmem>>, vector<8x256xf32>
    tpu.vector_store %arg5[%c24_25, %c0_26], %60 {strides = array<i32>} : memref<72x256xf32, #tpu.memory_space<vmem>>, vector<8x256xf32>,
    %62 = vector.broadcast %18 : vector<1x256xf32> to vector<8x256xf32>
    %63 = arith.mulf %45, %62 : vector<8x256xf32>
    %c32_27 = arith.constant 32 : index
    %c0_28 = arith.constant 0 : index
    %64 = vector.load %arg5[%c32_27, %c0_28] : memref<72x256xf32, #tpu.memory_space<vmem>>, vector<8x256xf32>
    tpu.vector_store %arg5[%c32_27, %c0_28], %63 {strides = array<i32>} : memref<72x256xf32, #tpu.memory_space<vmem>>, vector<8x256xf32>,
    %c252_i32 = arith.constant 252 : i32
    %65 = tpu.dynamic_rotate %45 by %c252_i32 dim 1 : vector<8x256xf32>, i32 -> vector<8x256xf32>
    %66 = vector.broadcast %19 : vector<1x256xf32> to vector<8x256xf32>
    %67 = arith.mulf %65, %66 : vector<8x256xf32>
    %c40_29 = arith.constant 40 : index
    %c0_30 = arith.constant 0 : index
    %68 = vector.load %arg5[%c40_29, %c0_30] : memref<72x256xf32, #tpu.memory_space<vmem>>, vector<8x256xf32>
    tpu.vector_store %arg5[%c40_29, %c0_30], %67 {strides = array<i32>} : memref<72x256xf32, #tpu.memory_space<vmem>>, vector<8x256xf32>,
    %c196_i32 = arith.constant 196 : i32
    %69 = tpu.dynamic_rotate %45 by %c196_i32 dim 1 : vector<8x256xf32>, i32 -> vector<8x256xf32>
    %70 = vector.broadcast %20 : vector<1x256xf32> to vector<8x256xf32>
    %71 = arith.mulf %69, %70 : vector<8x256xf32>
    %c48 = arith.constant 48 : index
    %c0_31 = arith.constant 0 : index
    %72 = vector.load %arg5[%c48, %c0_31] : memref<72x256xf32, #tpu.memory_space<vmem>>, vector<8x256xf32>
    tpu.vector_store %arg5[%c48, %c0_31], %71 {strides = array<i32>} : memref<72x256xf32, #tpu.memory_space<vmem>>, vector<8x256xf32>,
    %c192_i32 = arith.constant 192 : i32
    %73 = tpu.dynamic_rotate %45 by %c192_i32 dim 1 : vector<8x256xf32>, i32 -> vector<8x256xf32>
    %74 = vector.broadcast %21 : vector<1x256xf32> to vector<8x256xf32>
    %75 = arith.mulf %73, %74 : vector<8x256xf32>
    %c56 = arith.constant 56 : index
    %c0_32 = arith.constant 0 : index
    %76 = vector.load %arg5[%c56, %c0_32] : memref<72x256xf32, #tpu.memory_space<vmem>>, vector<8x256xf32>
    tpu.vector_store %arg5[%c56, %c0_32], %75 {strides = array<i32>} : memref<72x256xf32, #tpu.memory_space<vmem>>, vector<8x256xf32>,
    %c188_i32 = arith.constant 188 : i32
    %77 = tpu.dynamic_rotate %45 by %c188_i32 dim 1 : vector<8x256xf32>, i32 -> vector<8x256xf32>
    %78 = vector.broadcast %22 : vector<1x256xf32> to vector<8x256xf32>
    %79 = arith.mulf %77, %78 : vector<8x256xf32>
    %c64 = arith.constant 64 : index
    %c0_33 = arith.constant 0 : index
    %80 = vector.load %arg5[%c64, %c0_33] : memref<72x256xf32, #tpu.memory_space<vmem>>, vector<8x256xf32>
    tpu.vector_store %arg5[%c64, %c0_33], %79 {strides = array<i32>} : memref<72x256xf32, #tpu.memory_space<vmem>>, vector<8x256xf32>,
    %c0_34 = arith.constant 0 : index
    %c0_35 = arith.constant 0 : index
    %81 = vector.load %arg5[%c0_34, %c0_35] : memref<72x256xf32, #tpu.memory_space<vmem>>, vector<72x256xf32>
    %cst_36 = arith.constant dense<0.000000e+00> : vector<8x256xf32>
    %82 = tpu.matmul %3, %81, %cst_36 {dimension_numbers = #tpu.dot_dimension_numbers<[1], [0], [0], [1], [0, 0, 1, 1], [], []>} : vector<8x72xf32>, vector<72x256xf32>, vector<8x256xf32> -> vector<8x256xf32>
    %c68_i32_37 = arith.constant 68 : i32
    %83 = tpu.dynamic_rotate %82 by %c68_i32_37 dim 1 : vector<8x256xf32>, i32 -> vector<8x256xf32>
    %84 = vector.broadcast %14 : vector<1x256xf32> to vector<8x256xf32>
    %85 = arith.mulf %83, %84 : vector<8x256xf32>
    %c0_38 = arith.constant 0 : index
    %c0_39 = arith.constant 0 : index
    %86 = vector.load %arg5[%c0_38, %c0_39] : memref<72x256xf32, #tpu.memory_space<vmem>>, vector<8x256xf32>
    tpu.vector_store %arg5[%c0_38, %c0_39], %85 {strides = array<i32>} : memref<72x256xf32, #tpu.memory_space<vmem>>, vector<8x256xf32>,
    %c64_i32_40 = arith.constant 64 : i32
    %87 = tpu.dynamic_rotate %82 by %c64_i32_40 dim 1 : vector<8x256xf32>, i32 -> vector<8x256xf32>
    %88 = vector.broadcast %15 : vector<1x256xf32> to vector<8x256xf32>
    %89 = arith.mulf %87, %88 : vector<8x256xf32>
    %c8_41 = arith.constant 8 : index
    %c0_42 = arith.constant 0 : index
    %90 = vector.load %arg5[%c8_41, %c0_42] : memref<72x256xf32, #tpu.memory_space<vmem>>, vector<8x256xf32>
    tpu.vector_store %arg5[%c8_41, %c0_42], %89 {strides = array<i32>} : memref<72x256xf32, #tpu.memory_space<vmem>>, vector<8x256xf32>,
    %c60_i32_43 = arith.constant 60 : i32
    %91 = tpu.dynamic_rotate %82 by %c60_i32_43 dim 1 : vector<8x256xf32>, i32 -> vector<8x256xf32>
    %92 = vector.broadcast %16 : vector<1x256xf32> to vector<8x256xf32>
    %93 = arith.mulf %91, %92 : vector<8x256xf32>
    %c16_44 = arith.constant 16 : index
    %c0_45 = arith.constant 0 : index
    %94 = vector.load %arg5[%c16_44, %c0_45] : memref<72x256xf32, #tpu.memory_space<vmem>>, vector<8x256xf32>
    tpu.vector_store %arg5[%c16_44, %c0_45], %93 {strides = array<i32>} : memref<72x256xf32, #tpu.memory_space<vmem>>, vector<8x256xf32>,
    %c4_i32_46 = arith.constant 4 : i32
    %95 = tpu.dynamic_rotate %82 by %c4_i32_46 dim 1 : vector<8x256xf32>, i32 -> vector<8x256xf32>
    %96 = vector.broadcast %17 : vector<1x256xf32> to vector<8x256xf32>
    %97 = arith.mulf %95, %96 : vector<8x256xf32>
    %c24_47 = arith.constant 24 : index
    %c0_48 = arith.constant 0 : index
    %98 = vector.load %arg5[%c24_47, %c0_48] : memref<72x256xf32, #tpu.memory_space<vmem>>, vector<8x256xf32>
    tpu.vector_store %arg5[%c24_47, %c0_48], %97 {strides = array<i32>} : memref<72x256xf32, #tpu.memory_space<vmem>>, vector<8x256xf32>,
    %99 = vector.broadcast %18 : vector<1x256xf32> to vector<8x256xf32>
    %100 = arith.mulf %82, %99 : vector<8x256xf32>
    %c32_49 = arith.constant 32 : index
    %c0_50 = arith.constant 0 : index
    %101 = vector.load %arg5[%c32_49, %c0_50] : memref<72x256xf32, #tpu.memory_space<vmem>>, vector<8x256xf32>
    tpu.vector_store %arg5[%c32_49, %c0_50], %100 {strides = array<i32>} : memref<72x256xf32, #tpu.memory_space<vmem>>, vector<8x256xf32>,
    %c252_i32_51 = arith.constant 252 : i32
    %102 = tpu.dynamic_rotate %82 by %c252_i32_51 dim 1 : vector<8x256xf32>, i32 -> vector<8x256xf32>
    %103 = vector.broadcast %19 : vector<1x256xf32> to vector<8x256xf32>
    %104 = arith.mulf %102, %103 : vector<8x256xf32>
    %c40_52 = arith.constant 40 : index
    %c0_53 = arith.constant 0 : index
    %105 = vector.load %arg5[%c40_52, %c0_53] : memref<72x256xf32, #tpu.memory_space<vmem>>, vector<8x256xf32>
    tpu.vector_store %arg5[%c40_52, %c0_53], %104 {strides = array<i32>} : memref<72x256xf32, #tpu.memory_space<vmem>>, vector<8x256xf32>,
    %c196_i32_54 = arith.constant 196 : i32
    %106 = tpu.dynamic_rotate %82 by %c196_i32_54 dim 1 : vector<8x256xf32>, i32 -> vector<8x256xf32>
    %107 = vector.broadcast %20 : vector<1x256xf32> to vector<8x256xf32>
    %108 = arith.mulf %106, %107 : vector<8x256xf32>
    %c48_55 = arith.constant 48 : index
    %c0_56 = arith.constant 0 : index
    %109 = vector.load %arg5[%c48_55, %c0_56] : memref<72x256xf32, #tpu.memory_space<vmem>>, vector<8x256xf32>
    tpu.vector_store %arg5[%c48_55, %c0_56], %108 {strides = array<i32>} : memref<72x256xf32, #tpu.memory_space<vmem>>, vector<8x256xf32>,
    %c192_i32_57 = arith.constant 192 : i32
    %110 = tpu.dynamic_rotate %82 by %c192_i32_57 dim 1 : vector<8x256xf32>, i32 -> vector<8x256xf32>
    %111 = vector.broadcast %21 : vector<1x256xf32> to vector<8x256xf32>
    %112 = arith.mulf %110, %111 : vector<8x256xf32>
    %c56_58 = arith.constant 56 : index
    %c0_59 = arith.constant 0 : index
    %113 = vector.load %arg5[%c56_58, %c0_59] : memref<72x256xf32, #tpu.memory_space<vmem>>, vector<8x256xf32>
    tpu.vector_store %arg5[%c56_58, %c0_59], %112 {strides = array<i32>} : memref<72x256xf32, #tpu.memory_space<vmem>>, vector<8x256xf32>,
    %c188_i32_60 = arith.constant 188 : i32
    %114 = tpu.dynamic_rotate %82 by %c188_i32_60 dim 1 : vector<8x256xf32>, i32 -> vector<8x256xf32>
    %115 = vector.broadcast %22 : vector<1x256xf32> to vector<8x256xf32>
    %116 = arith.mulf %114, %115 : vector<8x256xf32>
    %c64_61 = arith.constant 64 : index
    %c0_62 = arith.constant 0 : index
    %117 = vector.load %arg5[%c64_61, %c0_62] : memref<72x256xf32, #tpu.memory_space<vmem>>, vector<8x256xf32>
    tpu.vector_store %arg5[%c64_61, %c0_62], %116 {strides = array<i32>} : memref<72x256xf32, #tpu.memory_space<vmem>>, vector<8x256xf32>,
    %c0_63 = arith.constant 0 : index
    %c0_64 = arith.constant 0 : index
    %118 = vector.load %arg5[%c0_63, %c0_64] : memref<72x256xf32, #tpu.memory_space<vmem>>, vector<72x256xf32>
    %cst_65 = arith.constant dense<0.000000e+00> : vector<8x256xf32>
    %119 = tpu.matmul %5, %118, %cst_65 {dimension_numbers = #tpu.dot_dimension_numbers<[1], [0], [0], [1], [0, 0, 1, 1], [], []>} : vector<8x72xf32>, vector<72x256xf32>, vector<8x256xf32> -> vector<8x256xf32>
    %120 = vector.broadcast %8 : vector<8x1xf32> to vector<8x256xf32>
    %121 = arith.mulf %119, %120 : vector<8x256xf32>
    %cst_66 = arith.constant dense<0.000000e+00> : vector<256xf32>
    %122 = vector.multi_reduction <add>, %121, %cst_66 [0] : vector<8x256xf32> to vector<256xf32>
    %123 = vector.shape_cast %122 : vector<256xf32> to vector<1x256xf32>
    %124 = vector.broadcast %9 : vector<1x1xf32> to vector<1x256xf32>
    %125 = arith.addf %123, %124 : vector<1x256xf32>
    %cst_67 = arith.constant 0.000000e+00 : f32
    %126 = vector.broadcast %cst_67 : f32 to vector<1x256xf32>
    %127 = arith.subf %126, %125 : vector<1x256xf32>
    %128 = math.exp %127 : vector<1x256xf32>
    %cst_68 = arith.constant 1.000000e+00 : f32
    %129 = vector.broadcast %cst_68 : f32 to vector<1x256xf32>
    %130 = arith.addf %129, %128 : vector<1x256xf32>
    %131 = tpu.reciprocal %130 {approx = true} : vector<1x256xf32> -> vector<1x256xf32>
    %132 = math.exp %131 : vector<1x256xf32>
    %133 = vector.broadcast %44 : vector<128x1xf32> to vector<128x256xf32>
    %134 = vector.broadcast %132 : vector<1x256xf32> to vector<128x256xf32>
    %135 = arith.addf %133, %134 : vector<128x256xf32>
    %cst_69 = arith.constant 1.000000e+00 : f32
    %136 = vector.broadcast %cst_69 : f32 to vector<128x256xf32>
    %137 = arith.addf %135, %136 : vector<128x256xf32>
    %138 = arith.mulf %24, %137 : vector<128x256xf32>
    %c0_70 = arith.constant 0 : index
    %c0_71 = arith.constant 0 : index
    %c0_72 = arith.constant 0 : index
    %139 = vector.load %arg4[%c0_70, %c0_71, %c0_72] : memref<1x128x256xf32, #tpu.memory_space<vmem>>, vector<1x128x256xf32>
    %140 = vector.shape_cast %139 : vector<1x128x256xf32> to vector<128x256xf32>
    %141 = vector.shape_cast %138 : vector<128x256xf32> to vector<1x128x256xf32>
    tpu.vector_store %arg4[%c0_70, %c0_71, %c0_72], %141 {strides = array<i32>} : memref<1x128x256xf32, #tpu.memory_space<vmem>>, vector<1x128x256xf32>,
    return
  }
  func.func @transform_0(%arg0: i32) -> (i32, i32, i32) {
    %c0_i32 = arith.constant 0 : i32
    %c0_i32_0 = arith.constant 0 : i32
    %c0_i32_1 = arith.constant 0 : i32
    return %arg0, %c0_i32, %c0_i32_0 : i32, i32, i32
  }
  func.func @transform_1(%arg0: i32) -> (i32, i32) {
    %c0_i32 = arith.constant 0 : i32
    %c0_i32_0 = arith.constant 0 : i32
    %c0_i32_1 = arith.constant 0 : i32
    return %c0_i32, %c0_i32_0 : i32, i32
  }
  func.func @transform_2(%arg0: i32) -> (i32, i32) {
    %c0_i32 = arith.constant 0 : i32
    %c0_i32_0 = arith.constant 0 : i32
    %c0_i32_1 = arith.constant 0 : i32
    return %c0_i32, %c0_i32_0 : i32, i32
  }
  func.func @transform_3(%arg0: i32) -> (i32, i32, i32) {
    %c0_i32 = arith.constant 0 : i32
    %c0_i32_0 = arith.constant 0 : i32
    %c0_i32_1 = arith.constant 0 : i32
    return %arg0, %c0_i32, %c0_i32_0 : i32, i32, i32
  }
}

</mosaic_0001>

<bundles_post_ra>
// kernel: tpu_custom_call.1
= control target key start
LH: loop header
LB: loop body
LE: loop exit
PB: predicated region body
PF: predicated region fallthrough
CT: control target
= control target key end

     0   :  { %8 = vsyncpa [#allocation4], 0  ;;  %s3248_s0 = inlined_call_operand.hbm [shape: f32[2,128,256], index: 0, kind: input, shape index: {}]   ;;  %s3249_s1 = inlined_call_operand.hbm [shape: f32[9,256], index: 1, kind: input, shape index: {}]   ;;  %s3250_s2 = inlined_call_operand.hbm [shape: f32[168,128], index: 2, kind: input, shape index: {}]   ;;  %s3251_s3 = inlined_call_operand.hbm [shape: f32[2,128,256], index: 3, kind: output, shape index: {}]  }
   0x1   :  { %10 = vsyncpa [#allocation4 + $0x1], 0 }
   0x2   :  { %11 = vsyncpa [#allocation7], 0 }
   0x3   :  { %12 = vsyncpa [#allocation5], 0 }
   0x4   :  { %14 = vsyncpa [#allocation5 + $0x1], 0  ;;  %s2309_s12 = smov 0   ;;  %s2311_s13 = smov 0  }
   0x5   :  { %s2313_s14 = smov 0   ;;  %s2315_s15 = smov 0  }
   0x6 LB: > { %s2330_s16 = sadd.s32 4294967295, %s2265_s15   ;;  %s1657_s17 = sadd.s32 4294967294, %s2265_s15   ;;  %s2265_s15 = sphi %s2315_s15, %s3293_s15   ;;  %s2261_s14 = sphi %s2313_s14, %s3292_s14   ;;  %s2257_s13 = sphi %s2311_s13, %s3291_s13   ;;  %s2253_s12 = sphi %s2309_s12, %s3290_s12  }
   0x7   : > { %p40_p0 = scmp.ne.s32.totalorder %s2257_s13, %s2253_s12  ;;  %p3252_p1 = scmp.eq.s32.totalorder %s2330_s16, 0 }
   0x8   : > { %p112_p3 = scmp.eq.s32.totalorder %s1657_s17, 1  ;;  %p1658_p5 = scmp.ge.s32.totalorder %s2265_s15, 1 }
   0x9   : > { %p2339_p4 = por %p3252_p1, %p40_p0  ;;  %p119_p7 = scmp.lt.s32.totalorder %s2265_s15, 3 }
   0xa   : > { %p2344_p6 = por %p112_p3, %p40_p0  ;;  %s2267_s21 = smov [#allocation6]  }
   0xb   : > { %s3257_s18 = scalar_select %p2339_p4, 1, 0 }
   0xc   : > { %s3258_s19 = scalar_select %p2344_p6, 1, 0 }
   0xd   : > { %p2349_p8 = pnand %p1658_p5, %p119_p7  ;;  %s131_s22 = sshll.u32 %s2267_s21, 4  ;;  %s2353_s22 = int_to_ptr.vmem [resolvable:$true] %s131_s22 }
   0xe   : > { %s2268_s24 = smov [#allocation8]   ;;  %s2109_s28 = scalar_lea.hbm %s3249_s1, 512 }
   0xf   : > { %p1892_p9 = pneg %p2349_p8  ;;  %s144_s25 = sshll.u32 %s2268_s24, 4  ;;  %s2364_s25 = int_to_ptr.vmem [resolvable:$true] %s144_s25 }
  0x10   : > { %p2110_p12 = scmp.ne.s32.totalorder %s3249_s1, %s2109_s28  ;;  %p2116_p5 = scmp.lt.u32.totalorder %s2109_s28, %s3249_s1 }
  0x11   : > { %p2360_p11 = pnand %p1892_p9, %p3252_p1 }
  0x13   : > { %p2111_p13 = pneg %p2360_p11 }
  0x15   : > { %p2112_p0 = pnand %p2111_p13, %p2110_p12 }
  0x17   : > { %p2113_p3 = pneg %p2112_p0 }
  0x19   : > { %p2118_p7 = pnand %p2116_p5, %p2113_p3 }
  0x1b   : > { %2121 = shalt.err (!%p2118_p7)
}
  0x1c   : > { %s2122_s6 = scalar_lea.vmem %s2353_s22, 512  ;;  %p2130_p2 = scmp.lt.s32.totalorder %s2353_s22, %s2353_s22 }
  0x1d   : > { %p2123_p9 = scmp.ne.s32.totalorder %s2353_s22, %s2122_s6  ;;  %p2131_p12 = scmp.lt.s32.totalorder %s2122_s6, %s2122_s6 }
  0x1f   : > { %p2125_p10 = pnand %p2123_p9, %p2111_p13  ;;  %p2132_p0 = por %p2131_p12, %p2130_p2 }
  0x21   : > { %p2126_p1 = pneg %p2125_p10 }
  0x23   : > { %p2133_p6 = pnand %p2132_p0, %p2126_p1 }
  0x25   : > { %2136 = shalt.err (!%p2133_p6)
}
  0x26   : > { %s2269_s7 = smov 256   ;;  %s2270_s8 = smov 16  }
  0x27   : > { %1895 = dma.hbm_to_vmem [thread:$0]  (!%p2360_p11), %s3249_s1, 512, %s2353_s22, [#allocation7], %s2269_s7, %s2269_s7, %s2270_s8  }
  0x28   : > { %s2137_s21 = scalar_lea.hbm %s3250_s2, 2688 }
  0x29   : > { %p2138_p1 = scmp.ne.s32.totalorder %s3250_s2, %s2137_s21  ;;  %p2144_p10 = scmp.lt.u32.totalorder %s2137_s21, %s3250_s2 }
  0x2b   : > { %p2140_p2 = pnand %p2138_p1, %p2111_p13 }
  0x2d   : > { %p2141_p6 = pneg %p2140_p2 }
  0x2f   : > { %p2146_p3 = pnand %p2144_p10, %p2141_p6 }
  0x31   : > { %2149 = shalt.err (!%p2146_p3)
}
  0x32   : > { %s2150_s22 = scalar_lea.vmem %s2364_s25, 2688  ;;  %p2158_p12 = scmp.lt.s32.totalorder %s2364_s25, %s2364_s25 }
  0x33   : > { %p2151_p5 = scmp.ne.s32.totalorder %s2364_s25, %s2150_s22  ;;  %p2159_p0 = scmp.lt.s32.totalorder %s2150_s22, %s2150_s22 }
  0x35   : > { %p2153_p7 = pnand %p2151_p5, %p2111_p13  ;;  %p2160_p1 = por %p2159_p0, %p2158_p12 }
  0x37   : > { %p2154_p9 = pneg %p2153_p7 }
  0x39   : > { %p2161_p2 = pnand %p2160_p1, %p2154_p9 }
  0x3b   : > { %2164 = shalt.err (!%p2161_p2)
}
  0x3c   : > { %s2271_s29 = smov 128   ;;  %s2272_s30 = smov 8  }
  0x3d   : > { %1898 = dma.hbm_to_vmem [thread:$0]  (!%p2360_p11), %s3250_s2, 2688, %s2364_s25, [#allocation7], %s2271_s29, %s2271_s29, %s2272_s30  }
  0x3e   : > { %s2422_s6 = sadd.s32 1, %s2265_s15   ;;  %s27_s10 = sadd.s32 1, %s2261_s14 }
  0x3f   : > { %s24_s9 = ssub.s32 %s2265_s15, %s2422_s6  ;;  %p34_p6 = scmp.ne.s32.totalorder %s2261_s14, %s2257_s13 }
  0x40   : > { %p25_p13 = scmp.eq.s32.totalorder %s24_s9, 0  ;;  %p35_p10 = scmp.eq.s32.totalorder %s2265_s15, 0 }
  0x41   : > { %p3261_p5 = scmp.eq.s32.totalorder %s2330_s16, 1  ;;  %p1909_p9 = scmp.lt.s32.totalorder %s2265_s15, 2 }
  0x42   : > { %s2431_s11 = scalar_select %p25_p13, %s2261_s14, %s27_s10  }
  0x43   : > { %p36_p3 = por %p35_p10, %p34_p6  ;;  %p2435_p7 = por %p3261_p5, %p34_p6 }
  0x44   : > { %s158_s23 = sand.u32 1, %s2261_s14   ;;  %s1695_s25 = sshll.u32 %s2265_s15, 12 }
  0x45   : > { %s3262_s17 = scalar_select %p2435_p7, 1, 0 }
  0x46   : > { %s1662_s21 = sshll.u32 %s158_s23, 8  ;;  %s2445_s27 = scalar_lea.hbm %s3248_s0, %s1695_s25 }
  0x47   : > { %s162_s28 = scalar_lea.vmem [#allocation3], %s1662_s21  ;;  %p2449_p11 = pnand %p1909_p9, %p36_p3 }
  0x48   : > { %s169_s22 = sshll.u32 %s162_s28, 4  ;;  %s2453_s30 = scalar_lea.sflag [#allocation4], %s158_s23  ;;  %s2447_s22 = int_to_ptr.vmem [resolvable:$true] %s169_s22 }
  0x49   : > { %s2165_s4 = scalar_lea.hbm %s2445_s27, 4096  ;;  %p2167_p0 = pneg %p2449_p11 }
  0x4a   : > { %p2166_p12 = scmp.ne.s32.totalorder %s2445_s27, %s2165_s4  ;;  %s2170_s10 = scalar_lea.hbm %s3248_s0, 8192 }
  0x4b   : > { %p2171_p13 = scmp.lt.u32.totalorder %s2445_s27, %s3248_s0  ;;  %p2172_p6 = scmp.lt.u32.totalorder %s2170_s10, %s2165_s4 }
  0x4c   : > { %p2168_p1 = pnand %p2167_p0, %p2166_p12  ;;  %p2174_p3 = scmp.lt.u32.totalorder %s2165_s4, %s2445_s27 }
  0x4d   : > { %p2173_p10 = por %p2172_p6, %p2171_p13 }
  0x4e   : > { %p2169_p2 = pneg %p2168_p1 }
  0x4f   : > { %p2175_p5 = por %p2174_p3, %p2173_p10 }
  0x51   : > { %p2176_p9 = pnand %p2175_p5, %p2169_p2 }
  0x53   : > { %2179 = shalt.err (!%p2176_p9)
}
  0x54   : > { %s2180_s23 = scalar_lea.vmem %s2447_s22, 4096  ;;  %s2273_s24 = smov [#allocation3]  }
  0x55   : > { %p2181_p12 = scmp.ne.s32.totalorder %s2447_s22, %s2180_s23  ;;  %s2185_s26 = sshll.u32 %s2273_s24, 4  ;;  %s2186_s26 = int_to_ptr.vmem [resolvable:$false] %s2185_s26 }
  0x56   : > { %s2187_s28 = scalar_lea.vmem %s2186_s26, 8192  ;;  %p2188_p4 = scmp.lt.s32.totalorder %s2447_s22, %s2186_s26 }
  0x57   : > { %p2183_p1 = pnand %p2181_p12, %p2167_p0  ;;  %p2189_p13 = scmp.lt.s32.totalorder %s2187_s28, %s2180_s23 }
  0x59   : > { %p2184_p7 = pneg %p2183_p1  ;;  %p2190_p6 = por %p2189_p13, %p2188_p4 }
  0x5b   : > { %p2191_p10 = pnand %p2190_p6, %p2184_p7 }
  0x5d   : > { %2194 = shalt.err (!%p2191_p10)
}
  0x5e   : > { %1902 = dma.hbm_to_vmem [thread:$0]  (!%p2449_p11), %s2445_s27, 4096, %s2447_s22, %s2453_s30, %s2269_s7, %s2269_s7, %s2270_s8  }
  0x5f   : > { %181 = sbr.rel (%p2349_p8) target bundleno = 1608 (0x648), region = 32 }
  0x66   : > { %s2487_s4 = sand.u32 1, %s2257_s13   ;;  %p3264_p4 = scmp.ne.s32.totalorder %s3257_s18, 0 }
  0x67   : > { %s1666_s5 = sshll.u32 %s2487_s4, 8  ;;  %s184_s9 = scalar_lea.sflag [#allocation4], %s2487_s4 }
  0x68   : > { %s2493_s29 = scalar_lea.vmem [#allocation3], %s1666_s5 }
  0x69   : > { %2240 = dma.done.wait (%p3264_p4), %s184_s9, 4096  }
  0x6a   : > { %2242 = vsyncadd (%p3264_p4), %s184_s9, 4294963200  ;;  %p3265_p7 = scmp.eq.s32.totalorder %s2330_s16, 0 }
  0x6c   : > { %2244 = dma.done.wait (%p3265_p7), [#allocation7], 3200   ;;  %p3266_p8 = pmov %p3265_p7 }
  0x6d   : > { %v2504_v0 = vld [vmem:[%s2493_s29] sm:$0xff]  ;;  %v2507_v1 = vld [vmem:[%s2493_s29 + $0x8] sm:$0xff]  ;;  %v2510_v2 = vld [vmem:[%s2493_s29 + $0x10] sm:$0xff]  ;;  %v2274_v30 = vmov 0.0|0.0   ;;  %vm2275_vm0 = vmmov 0   ;;  %vm539_vm1 = vcmask 64512  }
  0x6e   : > { %2246 = vsyncadd (%p3266_p8), [#allocation7], 4294964096  ;;  %v340_v3 = vmax.f32 %v2504_v0, %v2507_v1  ;;  %v275_v4 = vadd.f32 %v2507_v1, %v2504_v0  ;;  %v2517_v5 = vld [vmem:[%s2493_s29 + $0x18] sm:$0xff]  ;;  %v2524_v8 = vld [vmem:[%s2493_s29 + $0x30] sm:$0xff]  ;;  %1792 = vmatprep.subr.bf16.mxu0 %v2274_v30  ;;  %s2277_s18 = smov 64   ;;  %s2278_s20 = smov 68  }
  0x6f   : > { %v343_v6 = vmax.f32 %v2510_v2, %v2517_v5  ;;  %v278_v7 = vadd.f32 %v2517_v5, %v2510_v2  ;;  %v2527_v9 = vld [vmem:[%s2493_s29 + $0x38] sm:$0xff]  ;;  %v2530_v10 = vld [vmem:[%s2493_s29 + $0x20] sm:$0xff]  ;;  %v2533_v11 = vld [vmem:[%s2493_s29 + $0x28] sm:$0xff]  ;;  %s2279_s7 = smov 60   ;;  %s2280_s8 = smov 4   ;;  %vm1063_vm7 = vcmask 588800  }
  0x70   : > { %341 = vmax.xlane.f32.xlu1 %v340_v3  ;;  %276 = vadd.xlane.f32.xlu0 %v275_v4  ;;  %v284_v12 = vadd.f32 %v2527_v9, %v2524_v8  ;;  %v281_v13 = vadd.f32 %v2533_v11, %v2530_v10  ;;  %v349_v14 = vmax.f32 %v2524_v8, %v2527_v9  ;;  %v2544_v16 = vld [vmem:[%s2493_s29 + $0x50] sm:$0xff]  ;;  %v2547_v17 = vld [vmem:[%s2493_s29 + $0x58] sm:$0xff]  ;;  %v2550_v18 = vld [vmem:[%s2493_s29 + $0x40] sm:$0xff]  ;;  %v2276_v4 = vmov 0.0   ;;  %s2281_s27 = smov 124   ;;  %s2282_s22 = smov 120  }
  0x71   : > { %v346_v15 = vmax.f32 %v2530_v10, %v2533_v11  ;;  %v2553_v19 = vld [vmem:[%s2493_s29 + $0x48] sm:$0xff]  ;;  %v290_v20 = vadd.f32 %v2547_v17, %v2544_v16  ;;  %v355_v22 = vmax.f32 %v2544_v16, %v2547_v17  ;;  %v2564_v24 = vld [vmem:[%s2493_s29 + $0x70] sm:$0xff]  ;;  %v2567_v25 = vld [vmem:[%s2493_s29 + $0x78] sm:$0xff]  ;;  %1763 = vmatprep.mubr.msk.f32.mxu0 %vm2275_vm0, %v2276_v4  ;;  %s3107_s30 = scalar_lea.vmem [#allocation9], %s1666_s5  ;;  %s1696_s10 = sshll.u32 %s2330_s16, 12 }
  0x72   : > { %v287_v21 = vadd.f32 %v2553_v19, %v2550_v18  ;;  %v352_v23 = vmax.f32 %v2550_v18, %v2553_v19  ;;  %v2570_v26 = vld [vmem:[%s2493_s29 + $0x60] sm:$0xff]  ;;  %v2573_v27 = vld [vmem:[%s2493_s29 + $0x68] sm:$0xff]  ;;  %v296_v28 = vadd.f32 %v2567_v25, %v2564_v24  ;;  %v361_v31 = vmax.f32 %v2564_v24, %v2567_v25  ;;  %v2585_v33 = vld [vmem:[%s2493_s29 + $0x90] sm:$0xff]  ;;  %s1565_s21 = sshll.u32 %s3107_s30, 4  ;;  %s3184_s24 = scalar_lea.hbm %s3251_s3, %s1696_s10  ;;  %s3188_s21 = int_to_ptr.vmem [resolvable:$true] %s1565_s21 }
  0x73   : > { %v293_v29 = vadd.f32 %v2573_v27, %v2570_v26  ;;  %v358_v32 = vmax.f32 %v2570_v26, %v2573_v27  ;;  %v2588_v34 = vld [vmem:[%s2493_s29 + $0x98] sm:$0xff]  ;;  %v2591_v35 = vld [vmem:[%s2493_s29 + $0x80] sm:$0xff]  ;;  %v2594_v36 = vld [vmem:[%s2493_s29 + $0x88] sm:$0xff]  ;;  %s1552_s16 = scalar_lea.sflag [#allocation5], %s2487_s4  ;;  %s2195_s26 = scalar_lea.vmem %s3188_s21, 4096 }
  0x74   : > { %344 = vmax.xlane.f32.xlu1 %v343_v6  ;;  %279 = vadd.xlane.f32.xlu0 %v278_v7  ;;  %v302_v37 = vadd.f32 %v2588_v34, %v2585_v33  ;;  %v299_v38 = vadd.f32 %v2594_v36, %v2591_v35  ;;  %v367_v39 = vmax.f32 %v2585_v33, %v2588_v34  ;;  %v2605_v41 = vld [vmem:[%s2493_s29 + $0xb0] sm:$0xff]  ;;  %v2608_v42 = vld [vmem:[%s2493_s29 + $0xb8] sm:$0xff]  ;;  %v2611_v43 = vld [vmem:[%s2493_s29 + $0xa0] sm:$0xff]  ;;  %p2196_p11 = scmp.ne.s32.totalorder %s3188_s21, %s2195_s26  ;;  %p3287_p0 = scmp.ne.s32.totalorder %s3262_s17, 0 }
  0x75   : > { %v364_v40 = vmax.f32 %v2591_v35, %v2594_v36  ;;  %v2614_v44 = vld [vmem:[%s2493_s29 + $0xa8] sm:$0xff]  ;;  %v308_v45 = vadd.f32 %v2608_v42, %v2605_v41  ;;  %v373_v47 = vmax.f32 %v2605_v41, %v2608_v42  ;;  %v2625_v49 = vld [vmem:[%s2493_s29 + $0xd0] sm:$0xff]  ;;  %v2628_v50 = vld [vmem:[%s2493_s29 + $0xd8] sm:$0xff]  ;;  %s2286_s28 = smov [#allocation9]  }
  0x76   : > { %v305_v46 = vadd.f32 %v2614_v44, %v2611_v43  ;;  %v370_v48 = vmax.f32 %v2611_v43, %v2614_v44  ;;  %v2631_v51 = vld [vmem:[%s2493_s29 + $0xc0] sm:$0xff]  ;;  %v2634_v52 = vld [vmem:[%s2493_s29 + $0xc8] sm:$0xff]  ;;  %v314_v53 = vadd.f32 %v2628_v50, %v2625_v49  ;;  %v379_v55 = vmax.f32 %v2625_v49, %v2628_v50  ;;  %v2645_v57 = vld [vmem:[%s2493_s29 + $0xf0] sm:$0xff]  ;;  %p2197_p2 = pnand %p2196_p11, %p3287_p0  ;;  %s2199_s5 = sshll.u32 %s2286_s28, 4  ;;  %s2200_s5 = int_to_ptr.vmem [resolvable:$false] %s2199_s5 }
  0x77   : > { %v311_v54 = vadd.f32 %v2634_v52, %v2631_v51  ;;  %v376_v56 = vmax.f32 %v2631_v51, %v2634_v52  ;;  %v2648_v58 = vld [vmem:[%s2493_s29 + $0xf8] sm:$0xff]  ;;  %v2651_v59 = vld [vmem:[%s2493_s29 + $0xe0] sm:$0xff]  ;;  %v2654_v60 = vld [vmem:[%s2493_s29 + $0xe8] sm:$0xff]  ;;  %s2201_s9 = scalar_lea.vmem %s2200_s5, 8192  ;;  %p2202_p5 = scmp.lt.s32.totalorder %s3188_s21, %s2200_s5 }
  0x78   : > { %285 = vadd.xlane.f32.xlu1 %v284_v12  ;;  %282 = vadd.xlane.f32.xlu0 %v281_v13  ;;  %v320_v61 = vadd.f32 %v2648_v58, %v2645_v57  ;;  %v317_v62 = vadd.f32 %v2654_v60, %v2651_v59  ;;  %v385_v63 = vmax.f32 %v2645_v57, %v2648_v58  ;;  %p2198_p3 = pneg %p2197_p2  ;;  %p2203_p9 = scmp.lt.s32.totalorder %s2201_s9, %s2195_s26 }
  0x79   : > { %v382_v3 = vmax.f32 %v2651_v59, %v2654_v60 }
  0x7a   : > { %p2204_p12 = por %p2203_p9, %p2202_p5 }
  0x7c   : > { %350 = vmax.xlane.f32.xlu1 %v349_v14  ;;  %347 = vmax.xlane.f32.xlu0 %v346_v15  ;;  %p2205_p1 = pnand %p2204_p12, %p2198_p3 }
  0x80   : > { %291 = vadd.xlane.f32.xlu1 %v290_v20  ;;  %288 = vadd.xlane.f32.xlu0 %v287_v21 }
  0x84   : > { %356 = vmax.xlane.f32.xlu1 %v355_v22  ;;  %353 = vmax.xlane.f32.xlu0 %v352_v23 }
  0x88   : > { %297 = vadd.xlane.f32.xlu1 %v296_v28  ;;  %294 = vadd.xlane.f32.xlu0 %v293_v29 }
  0x8c   : > { %362 = vmax.xlane.f32.xlu1 %v361_v31  ;;  %359 = vmax.xlane.f32.xlu0 %v358_v32 }
  0x90   : > { %303 = vadd.xlane.f32.xlu1 %v302_v37  ;;  %300 = vadd.xlane.f32.xlu0 %v299_v38 }
  0x94   : > { %368 = vmax.xlane.f32.xlu1 %v367_v39  ;;  %365 = vmax.xlane.f32.xlu0 %v364_v40 }
  0x98   : > { %309 = vadd.xlane.f32.xlu1 %v308_v45  ;;  %306 = vadd.xlane.f32.xlu0 %v305_v46 }
  0x9c   : > { %374 = vmax.xlane.f32.xlu1 %v373_v47  ;;  %371 = vmax.xlane.f32.xlu0 %v370_v48 }
  0xa0   : > { %315 = vadd.xlane.f32.xlu1 %v314_v53  ;;  %312 = vadd.xlane.f32.xlu0 %v311_v54 }
  0xa4   : > { %380 = vmax.xlane.f32.xlu1 %v379_v55  ;;  %377 = vmax.xlane.f32.xlu0 %v376_v56 }
  0xa8   : > { %321 = vadd.xlane.f32.xlu1 %v320_v61  ;;  %318 = vadd.xlane.f32.xlu0 %v317_v62 }
  0xac   : > { %386 = vmax.xlane.f32.xlu1 %v385_v63  ;;  %383 = vmax.xlane.f32.xlu0 %v382_v3 }
  0xfd   : > { %v342_v6 = vpop.xlane.xlu1 %341  ;;  %v277_v7 = vpop.xlane.xlu0 %276 }
  0xfe   : > { %v324_v12 = vmul.f32 0.00390625, %v277_v7 }
 0x100   : > { %v388_v20 = vadd.f32 %v342_v6, %v324_v12 }
 0x101   : > { %v345_v13 = vpop.xlane.xlu1 %344  ;;  %v280_v14 = vpop.xlane.xlu0 %279 }
 0x102   : > { %v325_v15 = vmul.f32 0.00390625, %v280_v14 }
 0x104   : > { %v389_v21 = vadd.f32 %v345_v13, %v325_v15 }
 0x105   : > { %v286_v22 = vpop.xlane.xlu1 %285  ;;  %v283_v23 = vpop.xlane.xlu0 %282 }
 0x106   : > { %v1793_v28 = vpack.c.bf16 %v389_v21, %v388_v20  ;;  %v327_v29 = vmul.f32 0.00390625, %v286_v22  ;;  %v326_v31 = vmul.f32 0.00390625, %v283_v23 }
 0x108   : > { %1794 = vmatpush3.bf16.msra.mxu0 %v1793_v28 }
 0x109   : > { %v351_v32 = vpop.xlane.xlu1 %350  ;;  %v348_v37 = vpop.xlane.xlu0 %347  ;;  %1795 = vmatprep.subr.bf16.mxu0 %v2274_v30 }
 0x10a   : > { %v391_v38 = vadd.f32 %v351_v32, %v327_v29  ;;  %v390_v39 = vadd.f32 %v348_v37, %v326_v31 }
 0x10c   : > { %v1796_v40 = vpack.c.bf16 %v391_v38, %v390_v39 }
 0x10d   : > { %v292_v45 = vpop.xlane.xlu1 %291  ;;  %v289_v46 = vpop.xlane.xlu0 %288 }
 0x10e   : > { %1797 = vmatpush3.bf16.msra.mxu0 %v1796_v40  ;;  %v329_v47 = vmul.f32 0.00390625, %v292_v45  ;;  %v328_v48 = vmul.f32 0.00390625, %v289_v46 }
 0x10f   : > { %1798 = vmatprep.subr.bf16.mxu0 %v2274_v30 }
 0x111   : > { %v357_v53 = vpop.xlane.xlu1 %356  ;;  %v354_v54 = vpop.xlane.xlu0 %353 }
 0x112   : > { %v393_v55 = vadd.f32 %v357_v53, %v329_v47  ;;  %v392_v56 = vadd.f32 %v354_v54, %v328_v48 }
 0x114   : > { %v1799_v61 = vpack.c.bf16 %v393_v55, %v392_v56 }
 0x115   : > { %v298_v62 = vpop.xlane.xlu1 %297  ;;  %v295_v63 = vpop.xlane.xlu0 %294 }
 0x116   : > { %1800 = vmatpush3.bf16.msra.mxu0 %v1799_v61  ;;  %v331_v3 = vmul.f32 0.00390625, %v298_v62  ;;  %v330_v6 = vmul.f32 0.00390625, %v295_v63 }
 0x117   : > { %1801 = vmatprep.subr.bf16.mxu0 %v2274_v30 }
 0x119   : > { %v363_v7 = vpop.xlane.xlu1 %362  ;;  %v360_v12 = vpop.xlane.xlu0 %359 }
 0x11a   : > { %v395_v13 = vadd.f32 %v363_v7, %v331_v3  ;;  %v394_v14 = vadd.f32 %v360_v12, %v330_v6 }
 0x11c   : > { %v1802_v15 = vpack.c.bf16 %v395_v13, %v394_v14 }
 0x11d   : > { %v304_v20 = vpop.xlane.xlu1 %303  ;;  %v301_v21 = vpop.xlane.xlu0 %300 }
 0x11e   : > { %1803 = vmatpush3.bf16.msra.mxu0 %v1802_v15  ;;  %v333_v22 = vmul.f32 0.00390625, %v304_v20  ;;  %v332_v23 = vmul.f32 0.00390625, %v301_v21 }
 0x11f   : > { %1804 = vmatprep.subr.bf16.mxu0 %v2274_v30 }
 0x121   : > { %v369_v28 = vpop.xlane.xlu1 %368  ;;  %v366_v29 = vpop.xlane.xlu0 %365 }
 0x122   : > { %v397_v31 = vadd.f32 %v369_v28, %v333_v22  ;;  %v396_v32 = vadd.f32 %v366_v29, %v332_v23 }
 0x124   : > { %v1805_v37 = vpack.c.bf16 %v397_v31, %v396_v32  ;;  %v218_v31 = vld [vmem:[#allocation8] sm:$0xff]  ;;  %v2673_v32 = vld [vmem:[#allocation8 + $0x28] sm:$0xff] }
 0x125   : > { %v310_v38 = vpop.xlane.xlu1 %309  ;;  %v307_v39 = vpop.xlane.xlu0 %306  ;;  %1768 = vmatprep.mubr.msk.f32.mxu1 %vm539_vm1, %v2673_v32 }
 0x126   : > { %1806 = vmatpush3.bf16.msra.mxu0 %v1805_v37  ;;  %v335_v40 = vmul.f32 0.00390625, %v310_v38  ;;  %v334_v45 = vmul.f32 0.00390625, %v307_v39  ;;  %v2677_v37 = vld [vmem:[#allocation8 + $0x20] sm:$0xff] }
 0x127   : > { %1807 = vmatprep.subr.bf16.mxu0 %v2274_v30 }
 0x129   : > { %v375_v46 = vpop.xlane.xlu1 %374  ;;  %v372_v47 = vpop.xlane.xlu0 %371 }
 0x12a   : > { %v399_v48 = vadd.f32 %v375_v46, %v335_v40  ;;  %v398_v53 = vadd.f32 %v372_v47, %v334_v45  ;;  %v1816_v45 = vpack.c.bf16 %v2517_v5, %v2507_v1  ;;  %v2682_v46 = vld [vmem:[#allocation8 + $0x30] sm:$0xff]  ;;  %v1818_v47 = vpack.c.bf16 %v2510_v2, %v2504_v0  ;;  %v2694_v1 = vld [vmem:[#allocation8 + $0x40] sm:$0xff]  ;;  %v2698_v2 = vld [vmem:[#allocation8 + $0x48] sm:$0xff] }
 0x12b   : > { %v1822_v0 = vpack.c.bf16 %v2524_v8, %v2530_v10  ;;  %v1824_v5 = vpack.c.bf16 %v2547_v17, %v2553_v19  ;;  %v2710_v8 = vld [vmem:[#allocation8 + $0x58] sm:$0xff]  ;;  %v1828_v10 = vpack.c.bf16 %v2567_v25, %v2573_v27  ;;  %v2718_v17 = vld [vmem:[#allocation8 + $0x60] sm:$0xff]  ;;  %v1830_v19 = vpack.c.bf16 %v2564_v24, %v2570_v26  ;;  %v2730_v25 = vld [vmem:[#allocation8 + $0x70] sm:$0xff] }
 0x12c   : > { %v1808_v54 = vpack.c.bf16 %v399_v48, %v398_v53  ;;  %v2686_v48 = vld [vmem:[#allocation8 + $0x38] sm:$0xff]  ;;  %v1820_v53 = vpack.c.bf16 %v2527_v9, %v2533_v11  ;;  %v2706_v9 = vld [vmem:[#allocation8 + $0x50] sm:$0xff]  ;;  %v1826_v11 = vpack.c.bf16 %v2544_v16, %v2550_v18  ;;  %v2722_v16 = vld [vmem:[#allocation8 + $0x68] sm:$0xff]  ;;  %v1832_v18 = vpack.c.bf16 %v2588_v34, %v2594_v36 }
 0x12d   : > { %v316_v55 = vpop.xlane.xlu1 %315  ;;  %v313_v56 = vpop.xlane.xlu0 %312  ;;  %v1834_v27 = vpack.c.bf16 %v2585_v33, %v2591_v35  ;;  %v2734_v24 = vld [vmem:[#allocation8 + $0x78] sm:$0xff]  ;;  %v1836_v26 = vpack.c.bf16 %v2608_v42, %v2614_v44  ;;  %v2742_v34 = vld [vmem:[#allocation8 + $0x80] sm:$0xff]  ;;  %v1838_v36 = vpack.c.bf16 %v2605_v41, %v2611_v43  ;;  %v2746_v33 = vld [vmem:[#allocation8 + $0x88] sm:$0xff]  ;;  %v1840_v35 = vpack.c.bf16 %v2628_v50, %v2634_v52 }
 0x12e   : > { %1809 = vmatpush3.bf16.msra.mxu0 %v1808_v54  ;;  %v337_v61 = vmul.f32 0.00390625, %v316_v55  ;;  %v336_v62 = vmul.f32 0.00390625, %v313_v56  ;;  %v2754_v42 = vld [vmem:[#allocation8 + $0x90] sm:$0xff]  ;;  %v1842_v44 = vpack.c.bf16 %v2625_v49, %v2631_v51  ;;  %v2758_v41 = vld [vmem:[#allocation8 + $0x98] sm:$0xff]  ;;  %v1844_v43 = vpack.c.bf16 %v2648_v58, %v2654_v60  ;;  %v2766_v50 = vld [vmem:[#allocation8 + $0xa0] sm:$0xff] }
 0x12f   : > { %1810 = vmatprep.subr.bf16.mxu0 %v2274_v30  ;;  %v1846_v52 = vpack.c.bf16 %v2645_v57, %v2651_v59  ;;  %v219_v49 = vld [vmem:[#allocation8 + $0x8] sm:$0xff] }
 0x131   : > { %v381_v63 = vpop.xlane.xlu1 %380  ;;  %v378_v3 = vpop.xlane.xlu0 %377 }
 0x132   : > { %v401_v6 = vadd.f32 %v381_v63, %v337_v61  ;;  %v400_v7 = vadd.f32 %v378_v3, %v336_v62 }
 0x134   : > { %v1811_v12 = vpack.c.bf16 %v401_v6, %v400_v7 }
 0x135   : > { %v322_v13 = vpop.xlane.xlu1 %321  ;;  %v319_v14 = vpop.xlane.xlu0 %318 }
 0x136   : > { %1812 = vmatpush3.bf16.msra.mxu0 %v1811_v12  ;;  %v339_v15 = vmul.f32 0.00390625, %v322_v13  ;;  %v338_v20 = vmul.f32 0.00390625, %v319_v14 }
 0x137   : > { %1813 = vmatprep.subr.bf16.mxu0 %v2274_v30 }
 0x139   : > { %v387_v21 = vpop.xlane.xlu1 %386  ;;  %v384_v22 = vpop.xlane.xlu0 %383 }
 0x13a   : > { %v403_v23 = vadd.f32 %v387_v21, %v339_v15  ;;  %v402_v28 = vadd.f32 %v384_v22, %v338_v20  ;;  %v904_v15 = vlaneseq }
 0x13c   : > { %v1814_v29 = vpack.c.bf16 %v403_v23, %v402_v28  ;;  %v2830_v20 = vshrl.u32 %v904_v15, 7  ;;  %v2832_v22 = vand.u32 127, %v904_v15 }
 0x13e   : > { %1815 = vmatpush3.bf16.msra.mxu0 %v1814_v29  ;;  %v2835_v23 = vsub.s32 0, %v2830_v20  ;;  %v930_v29 = vsub.s32 1, %v2830_v20  ;;  %vm906_vm2 = vcmp.lt.s32.totalorder %v2832_v22, 68  ;;  %vm925_vm3 = vcmp.lt.s32.totalorder %v2832_v22, 64 }
 0x13f   : > { %vm944_vm4 = vcmp.lt.s32.totalorder %v2832_v22, 60  ;;  %vm963_vm5 = vcmp.lt.s32.totalorder %v2832_v22, 4  ;;  %vm994_vm6 = vcmp.lt.s32.totalorder %v2832_v22, 124 }
 0x140   : > { %3276 = vst [vmem:[#allocation22_spill] sm:$0xff] %v2835_v23 }
 0x141   : > { %1764 = vmatmul.mubr.f32.vlgmr.msra.gmra.mrb[0].mxu0 %v218_v31  ;;  %v2838_v31 = vld [vmem:[#allocation6] sm:$0xff] }
 0x142   : > { %1131 = vmatprep.mubr.f32.mxu0 %v2276_v4 }
 0x214   : > { %v470_v30 = vpop.f32.mrb[0].mxu0 }
 0x215   : > { %v471_v38 = vadd.f32 %v470_v30, %v2677_v37  ;;  %v1765_v39 = vpop.f32.mrb[1].mxu0 }
 0x216   : > { %v2843_v39 = vrot.slane %v2838_v31, %v2835_v23 }
 0x217   : > { %v474_v40 = vmax.f32 %v471_v38, 0.0  ;;  %v240_v38 = vld [vmem:[#allocation6 + $0x8] sm:$0xff] }
 0x219   : > { %1766 = vmatprep.subr.mxu1 %v474_v40 }
 0x21a   : > { %1767 = vmatpush3.msra.mxu1 %v474_v40  ;;  %v2846_v40 = vrot.slane %v240_v38, %v2835_v23 }
 0x21b   : > { %1769 = vmatmul.mubr.msk.f32.vlgmr.msra.gmra.mrb[0].mxu1 %vm539_vm1, %v2682_v46  ;;  %1817 = vmatprep.subr.bf16.mxu1 %v1816_v45  ;;  %v2850_v45 = vrot.slane %v2838_v31, %v930_v29 }
 0x21c   : > { %1819 = vmatpush1.bf16.msra.mxu1 %v1818_v47  ;;  %1771 = vmatprep.mubr.msk.f32.mxu1 %vm539_vm1, %v2686_v48  ;;  %v2852_v47 = vrot.slane %v240_v38, %v930_v29  ;;  %v999_v29 = vsub.s32 5, %v2830_v20 }
 0x21d   : > { %1821 = vmatprep.subr.bf16.mxu1 %v1820_v53 }
 0x21f   : > { %1772 = vmatmul.mubr.msk.f32.gmra.mrb[2].mxu1 %vm539_vm1, %v2694_v1 }
 0x220   : > { %1823 = vmatpush1.bf16.msra.mxu1 %v1822_v0  ;;  %1774 = vmatprep.mubr.msk.f32.mxu1 %vm539_vm1, %v2698_v2 }
 0x221   : > { %1825 = vmatprep.subr.bf16.mxu1 %v1824_v5 }
 0x223   : > { %1775 = vmatmul.mubr.msk.f32.gmra.mrb[4].mxu1 %vm539_vm1, %v2706_v9 }
 0x224   : > { %1827 = vmatpush1.bf16.msra.mxu1 %v1826_v11  ;;  %1777 = vmatprep.mubr.msk.f32.mxu1 %vm539_vm1, %v2710_v8 }
 0x225   : > { %1829 = vmatprep.subr.bf16.mxu1 %v1828_v10 }
 0x227   : > { %1778 = vmatmul.mubr.msk.f32.gmra.mrb[6].mxu1 %vm539_vm1, %v2718_v17 }
 0x228   : > { %1831 = vmatpush1.bf16.msra.mxu1 %v1830_v19  ;;  %1780 = vmatprep.mubr.msk.f32.mxu1 %vm539_vm1, %v2722_v16 }
 0x229   : > { %1833 = vmatprep.subr.bf16.mxu1 %v1832_v18  ;;  %v949_v18 = vsub.s32 2, %v2830_v20 }
 0x22b   : > { %1781 = vmatmul.mubr.msk.f32.gmra.mrb[8].mxu1 %vm539_vm1, %v2730_v25 }
 0x22c   : > { %1835 = vmatpush1.bf16.msra.mxu1 %v1834_v27  ;;  %1783 = vmatprep.mubr.msk.f32.mxu1 %vm539_vm1, %v2734_v24  ;;  %v968_v27 = vsub.s32 3, %v2830_v20 }
 0x22d   : > { %1837 = vmatprep.subr.bf16.mxu1 %v1836_v26 }
 0x22e   : > { %v2882_v23 = vrot.slane %v2838_v31, %v968_v27 }
 0x22f   : > { %1784 = vmatmul.mubr.msk.f32.gmra.mrb[10].mxu1 %vm539_vm1, %v2742_v34 }
 0x230   : > { %1839 = vmatpush1.bf16.msra.mxu1 %v1838_v36  ;;  %1786 = vmatprep.mubr.msk.f32.mxu1 %vm539_vm1, %v2746_v33 }
 0x231   : > { %1841 = vmatprep.subr.bf16.mxu1 %v1840_v35 }
 0x233   : > { %1787 = vmatmul.mubr.msk.f32.gmra.mrb[12].mxu1 %vm539_vm1, %v2754_v42 }
 0x234   : > { %1843 = vmatpush1.bf16.msra.mxu1 %v1842_v44  ;;  %1789 = vmatprep.mubr.msk.f32.mxu1 %vm539_vm1, %v2758_v41 }
 0x235   : > { %1845 = vmatprep.subr.bf16.mxu1 %v1844_v43  ;;  %v980_v43 = vsub.s32 4, %v2830_v20 }
 0x237   : > { %1790 = vmatmul.mubr.msk.f32.gmra.mrb[14].mxu1 %vm539_vm1, %v2766_v50 }
 0x238   : > { %1847 = vmatpush1.bf16.msra.mxu1 %v1846_v52  ;;  %893 = vmatprep.mubr.f32.mxu1 %v2276_v4  ;;  %v1023_v52 = vsub.s32 7, %v2830_v20 }
 0x23b   : > { %894 = vmatmul.mubr.f32.vlgmr.msra.gmra.mrb[16].mxu1 %v219_v49 }
 0x23c   : > { %1289 = vmatprep.mubr.f32.mxu1 %v2276_v4 }
 0x2ee   : > { %v2774_v51 = vpop.f32.mrb[0].mxu1 }
 0x2ef   : > { %v2776_v58 = vpop.f32.mrb[1].mxu1 }
 0x2f2   : > { %v2778_v60 = vpop.f32.mrb[2].mxu1 }
 0x2f3   : > { %v2780_v54 = vpop.f32.mrb[3].mxu1 }
 0x2f6   : > { %v2782_v57 = vpop.f32.mrb[4].mxu1 }
 0x2f7   : > { %v2784_v59 = vpop.f32.mrb[5].mxu1 }
 0x2fa   : > { %v2786_v55 = vpop.f32.mrb[6].mxu1 }
 0x2fb   : > { %3267 = vst [vmem:[#allocation13_spill] sm:$0xff] %v2786_v55  ;;  %v2788_v56 = vpop.f32.mrb[7].mxu1 }
 0x2fe   : > { %v2790_v61 = vpop.f32.mrb[8].mxu1 }
 0x2ff   : > { %3268 = vst [vmem:[#allocation14_spill] sm:$0xff] %v2790_v61  ;;  %v2792_v62 = vpop.f32.mrb[9].mxu1 }
 0x300   : > { %3269 = vst [vmem:[#allocation15_spill] sm:$0xff] %v2792_v62 }
 0x302   : > { %v2794_v4 = vpop.f32.mrb[10].mxu1 }
 0x303   : > { %3270 = vst [vmem:[#allocation16_spill] sm:$0xff] %v2794_v4  ;;  %v2796_v63 = vpop.f32.mrb[11].mxu1 }
 0x304   : > { %3271 = vst [vmem:[#allocation17_spill] sm:$0xff] %v2796_v63 }
 0x306   : > { %v2798_v3 = vpop.f32.mrb[12].mxu1 }
 0x307   : > { %3272 = vst [vmem:[#allocation18_spill] sm:$0xff] %v2798_v3  ;;  %v2800_v6 = vpop.f32.mrb[13].mxu1 }
 0x308   : > { %3273 = vst [vmem:[#allocation19_spill] sm:$0xff] %v2800_v6 }
 0x30a   : > { %v2802_v7 = vpop.f32.mrb[14].mxu1 }
 0x30b   : > { %3274 = vst [vmem:[#allocation20_spill] sm:$0xff] %v2802_v7  ;;  %v2804_v12 = vpop.f32.mrb[15].mxu1  ;;  %v2884_v7 = vrot.slane %v240_v38, %v968_v27 }
 0x30c   : > { %3275 = vst [vmem:[#allocation21_spill] sm:$0xff] %v2804_v12  ;;  %v2897_v12 = vrot.slane %v240_v38, %v980_v43 }
 0x30e   : > { %v2806_v13 = vpop.f32.mrb[16].mxu1 }
 0x30f   : > { %921 = vrot.lane.b32.xlu1 %v2806_v13, %s2277_s18  ;;  %900 = vrot.lane.b32.xlu0 %v2806_v13, %s2278_s20  ;;  %v2812_v14 = vpop.f32.mrb[17].mxu1 }
 0x313   : > { %940 = vrot.lane.b32.xlu0 %v2806_v13, %s2279_s7  ;;  %902 = vrot.lane.b32.xlu1 %v2812_v14, %s2278_s20 }
 0x317   : > { %959 = vrot.lane.b32.xlu0 %v2806_v13, %s2280_s8  ;;  %923 = vrot.lane.b32.xlu1 %v2812_v14, %s2277_s18 }
 0x31b   : > { %990 = vrot.lane.b32.xlu0 %v2806_v13, %s2281_s27  ;;  %942 = vrot.lane.b32.xlu1 %v2812_v14, %s2279_s7 }
 0x31f   : > { %961 = vrot.lane.b32.xlu1 %v2812_v14, %s2280_s8 }
 0x323   : > { %992 = vrot.lane.b32.xlu1 %v2812_v14, %s2281_s27 }
 0x381   : > { %v922_v21 = vpop.permute.xlu1 %921  ;;  %v901_v28 = vpop.permute.xlu0 %900 }
 0x385   : > { %v903_v30 = vpop.permute.xlu1 %902  ;;  %v941_v5 = vpop.permute.xlu0 %940 }
 0x386   : > { %v2856_v53 = vsel %vm906_vm2, %v901_v28, %v903_v30  ;;  %v908_v0 = vsel %vm906_vm2, %v903_v30, %v901_v28  ;;  %v2875_v28 = vrot.slane %v2838_v31, %v949_v18 }
 0x387   : > { %v917_v26 = vmul.f32 %v2843_v39, %v908_v0  ;;  %v918_v36 = vmul.f32 %v2846_v40, %v2856_v53 }
 0x389   : > { %v924_v11 = vpop.permute.xlu1 %923  ;;  %v960_v30 = vpop.permute.xlu0 %959 }
 0x38a   : > { %v926_v10 = vsel %vm925_vm3, %v922_v21, %v924_v11  ;;  %v927_v19 = vsel %vm925_vm3, %v924_v11, %v922_v21  ;;  %v2878_v11 = vrot.slane %v240_v38, %v949_v18  ;;  %v1011_v18 = vsub.s32 6, %v2830_v20 }
 0x38b   : > { %v936_v35 = vmul.f32 %v2850_v45, %v927_v19  ;;  %v937_v44 = vmul.f32 %v2852_v47, %v926_v10 }
 0x38c   : > { %v2912_v4 = vrot.slane %v240_v38, %v1011_v18 }
 0x38d   : > { %v1850_v49 = vpack.c.bf16 %v936_v35, %v917_v26  ;;  %v943_v15 = vpop.permute.xlu1 %942  ;;  %v1848_v21 = vpack.c.bf16 %v937_v44, %v918_v36  ;;  %v2891_v35 = vrot.slane %v2838_v31, %v980_v43  ;;  %v2894_v44 = vrot.slane %v240_v38, %v1023_v52  ;;  %v991_v63 = vpop.permute.xlu0 %990 }
 0x38e   : > { %v945_v26 = vsel %vm944_vm4, %v941_v5, %v943_v15  ;;  %v946_v36 = vsel %vm944_vm4, %v943_v15, %v941_v5  ;;  %v2904_v5 = vrot.slane %v2838_v31, %v999_v29 }
 0x38f   : > { %1849 = vmatprep.subr.bf16.mxu0 %v1848_v21  ;;  %v955_v20 = vmul.f32 %v2875_v28, %v946_v36  ;;  %v956_v15 = vmul.f32 %v2878_v11, %v945_v26 }
 0x390   : > { %1851 = vmatpush1.bf16.msra.mxu0 %v1850_v49  ;;  %v2906_v49 = vrot.slane %v240_v38, %v999_v29  ;;  %v986_v29 = vmul.f32 %v2891_v35, %v2806_v13  ;;  %v1018_v13 = vmul.f32 %v2912_v4, %v908_v0  ;;  %v220_v0 = vld [vmem:[#allocation8 + $0x10] sm:$0xff] }
 0x391   : > { %v962_v21 = vpop.permute.xlu1 %961 }
 0x392   : > { %v964_v27 = vsel %vm963_vm5, %v960_v30, %v962_v21  ;;  %v965_v3 = vsel %vm963_vm5, %v962_v21, %v960_v30  ;;  %v2915_v30 = vrot.slane %v2838_v31, %v1023_v52  ;;  %v987_v52 = vmul.f32 %v2897_v12, %v2812_v14  ;;  %v2937_v14 = vld [vmem:[#allocation6 + $0x10] ss:$0 sm:$0xff] }
 0x393   : > { %v974_v6 = vmul.f32 %v2882_v23, %v965_v3  ;;  %v975_v43 = vmul.f32 %v2884_v7, %v964_v27  ;;  %v1030_v27 = vmul.f32 %v2894_v44, %v927_v19 }
 0x395   : > { %v1854_v61 = vpack.c.bf16 %v974_v6, %v955_v20  ;;  %v993_v62 = vpop.permute.xlu1 %992  ;;  %v1852_v55 = vpack.c.bf16 %v975_v43, %v956_v15  ;;  %v2929_v20 = vrot.slane %v2838_v31, %v1011_v18  ;;  %v1041_v31 = vmul.f32 %v2937_v14, %v945_v26 }
 0x396   : > { %v995_v21 = vsel %vm994_vm6, %v991_v63, %v993_v62  ;;  %v996_v3 = vsel %vm994_vm6, %v993_v62, %v991_v63  ;;  %v1029_v62 = vmul.f32 %v2915_v30, %v926_v10  ;;  %v1860_v63 = vpack.c.bf16 %v1030_v27, %v1018_v13 }
 0x397   : > { %v1005_v38 = vmul.f32 %v2904_v5, %v995_v21  ;;  %v1006_v6 = vmul.f32 %v2906_v49, %v996_v3  ;;  %1853 = vmatprep.subr.bf16.mxu0 %v1852_v55  ;;  %v1017_v19 = vmul.f32 %v2929_v20, %v2856_v53  ;;  %v2935_v21 = vld [vmem:[#allocation6 + $0x18] ss:$0 sm:$0xff] }
 0x398   : > { %1855 = vmatpush1.bf16.msra.mxu0 %v1854_v61  ;;  %v1042_v61 = vmul.f32 %v2935_v21, %v946_v36 }
 0x399   : > { %v1858_v15 = vpack.c.bf16 %v1005_v38, %v986_v29  ;;  %v1856_v43 = vpack.c.bf16 %v1006_v6, %v987_v52  ;;  %v1862_v55 = vpack.c.bf16 %v1029_v62, %v1017_v19 }
 0x39b   : > { %1857 = vmatprep.subr.bf16.mxu0 %v1856_v43 }
 0x39c   : > { %1859 = vmatpush1.bf16.msra.mxu0 %v1858_v15 }
 0x39d   : > { %1861 = vmatprep.subr.bf16.mxu0 %v1860_v63 }
 0x3a0   : > { %1863 = vmatpush1.bf16.msra.mxu0 %v1862_v55 }
 0x3a1   : > { %1083 = vmatprep.subr.mxu0 %v1042_v61 }
 0x3a4   : > { %1084 = vmatpush1.msra.mxu0 %v1041_v31 }
 0x3a5   : > { %1688 = vmatmul.mubr.msk.f32.vlgmr.msra.gmra.mrb[2].mxu0 %vm1063_vm7, %v220_v0 }
 0x478   : > { %v2942_v10 = vpop.f32.mrb[2].mxu0 }
 0x479   : > { %1138 = vrot.lane.b32.xlu0 %v2942_v10, %s2278_s20  ;;  %v2946_v53 = vpop.f32.mrb[3].mxu0  ;;  %v1178_v62 = vmul.f32 %v2942_v10, %v2891_v35 }
 0x47a   : > { %1140 = vrot.lane.b32.xlu1 %v2946_v53, %s2278_s20 }
 0x47d   : > { %1148 = vrot.lane.b32.xlu0 %v2942_v10, %s2277_s18 }
 0x47e   : > { %1150 = vrot.lane.b32.xlu1 %v2946_v53, %s2277_s18 }
 0x481   : > { %1158 = vrot.lane.b32.xlu0 %v2942_v10, %s2279_s7 }
 0x482   : > { %1160 = vrot.lane.b32.xlu1 %v2946_v53, %s2279_s7 }
 0x485   : > { %1168 = vrot.lane.b32.xlu0 %v2942_v10, %s2280_s8 }
 0x486   : > { %1170 = vrot.lane.b32.xlu1 %v2946_v53, %s2280_s8 }
 0x489   : > { %1182 = vrot.lane.b32.xlu0 %v2942_v10, %s2281_s27 }
 0x48a   : > { %1184 = vrot.lane.b32.xlu1 %v2946_v53, %s2281_s27 }
 0x48d   : > { %491 = vrot.lane.b32.xlu0 %v2673_v32, %s2282_s22  ;;  %v2283_v32 = vmov 2  }
 0x48e   : > { %493 = vrot.lane.b32.xlu1 %v2682_v46, %s2282_s22  ;;  %v2284_v46 = vmov 1  }
 0x48f   : > { %1966 = vset.pattern.permute.xlu1 %v2283_v32  ;;  %1965 = vset.pattern.permute.xlu0 %v2284_v46 }
 0x491   : > { %495 = vrot.lane.b32.xlu0 %v2686_v48, %s2282_s22  ;;  %v2285_v48 = vmov 0  }
 0x492   : > { %497 = vrot.lane.b32.xlu1 %v2694_v1, %s2282_s22 }
 0x495   : > { %499 = vrot.lane.b32.xlu0 %v2698_v2, %s2282_s22 }
 0x496   : > { %501 = vrot.lane.b32.xlu1 %v2706_v9, %s2282_s22 }
 0x499   : > { %503 = vrot.lane.b32.xlu0 %v2710_v8, %s2282_s22 }
 0x49a   : > { %505 = vrot.lane.b32.xlu1 %v2718_v17, %s2282_s22 }
 0x49d   : > { %507 = vrot.lane.b32.xlu0 %v2722_v16, %s2282_s22 }
 0x49e   : > { %509 = vrot.lane.b32.xlu1 %v2730_v25, %s2282_s22 }
 0x4a1   : > { %511 = vrot.lane.b32.xlu0 %v2734_v24, %s2282_s22 }
 0x4a2   : > { %513 = vrot.lane.b32.xlu1 %v2742_v34, %s2282_s22 }
 0x4a5   : > { %515 = vrot.lane.b32.xlu0 %v2746_v33, %s2282_s22 }
 0x4a6   : > { %517 = vrot.lane.b32.xlu1 %v2754_v42, %s2282_s22 }
 0x4a9   : > { %519 = vrot.lane.b32.xlu0 %v2758_v41, %s2282_s22 }
 0x4aa   : > { %521 = vrot.lane.b32.xlu1 %v2766_v50, %s2282_s22 }
 0x4ad   : > { %1298 = vperm.xlu0 %1965, %v2677_v37  }
 0x4ae   : > { %1316 = vperm.xlu1 %1966, %v2677_v37  }
 0x4b1   : > { %1968 = vset.pattern.permute.xlu0 %v2285_v48 }
 0x4b2   : > { %1967 = vset.pattern.permute.xlu1 %v2285_v48 }
 0x4eb   : > { %v1139_v1 = vpop.permute.xlu0 %1138 }
 0x4ec   : > { %v1141_v2 = vpop.permute.xlu1 %1140 }
 0x4ed   : > { %v1142_v9 = vsel %vm906_vm2, %v1139_v1, %v1141_v2  ;;  %v1143_v8 = vsel %vm906_vm2, %v1141_v2, %v1139_v1 }
 0x4ee   : > { %v1144_v37 = vmul.f32 %v1143_v8, %v2843_v39  ;;  %v1145_v34 = vmul.f32 %v1142_v9, %v2846_v40  ;;  %v1193_v35 = vmul.f32 %v1143_v8, %v2912_v4  ;;  %v1192_v32 = vmul.f32 %v1142_v9, %v2929_v20 }
 0x4ef   : > { %v1149_v17 = vpop.permute.xlu0 %1148 }
 0x4f0   : > { %v1151_v16 = vpop.permute.xlu1 %1150 }
 0x4f1   : > { %v1152_v25 = vsel %vm925_vm3, %v1149_v17, %v1151_v16  ;;  %v1153_v24 = vsel %vm925_vm3, %v1151_v16, %v1149_v17 }
 0x4f2   : > { %v1154_v33 = vmul.f32 %v1153_v24, %v2850_v45  ;;  %v1155_v42 = vmul.f32 %v1152_v25, %v2852_v47  ;;  %v1196_v10 = vmul.f32 %v1152_v25, %v2915_v30 }
 0x4f3   : > { %v1159_v41 = vpop.permute.xlu0 %1158 }
 0x4f4   : > { %v1866_v50 = vpack.c.bf16 %v1154_v33, %v1144_v37  ;;  %v1161_v26 = vpop.permute.xlu1 %1160  ;;  %v1864_v36 = vpack.c.bf16 %v1155_v42, %v1145_v34  ;;  %v221_v37 = vld [vmem:[#allocation8 + $0x18] sm:$0xff] }
 0x4f5   : > { %v1162_v18 = vsel %vm944_vm4, %v1159_v41, %v1161_v26  ;;  %v1163_v29 = vsel %vm944_vm4, %v1161_v26, %v1159_v41 }
 0x4f6   : > { %1865 = vmatprep.subr.bf16.mxu1 %v1864_v36  ;;  %v1164_v47 = vmul.f32 %v1163_v29, %v2875_v28  ;;  %v1165_v27 = vmul.f32 %v1162_v18, %v2878_v11  ;;  %v1197_v28 = vmul.f32 %v1153_v24, %v2894_v44  ;;  %v1201_v30 = vmul.f32 %v2935_v21, %v1163_v29 }
 0x4f7   : > { %v1169_v3 = vpop.permute.xlu0 %1168  ;;  %1867 = vmatpush1.bf16.msra.mxu1 %v1866_v50  ;;  %v3277_v50 = vld [vmem:[#allocation13_spill] sm:$0xff] }
 0x4f8   : > { %v1171_v39 = vpop.permute.xlu1 %1170 }
 0x4f9   : > { %v1172_v40 = vsel %vm963_vm5, %v1169_v3, %v1171_v39  ;;  %v1173_v45 = vsel %vm963_vm5, %v1171_v39, %v1169_v3  ;;  %v3278_v3 = vld [vmem:[#allocation15_spill] sm:$0xff] }
 0x4fa   : > { %v1174_v38 = vmul.f32 %v1173_v45, %v2882_v23  ;;  %v1175_v6 = vmul.f32 %v1172_v40, %v2884_v7  ;;  %v1179_v7 = vmul.f32 %v2946_v53, %v2897_v12 }
 0x4fb   : > { %v1183_v52 = vpop.permute.xlu0 %1182 }
 0x4fc   : > { %v1870_v13 = vpack.c.bf16 %v1174_v38, %v1164_v47  ;;  %v1185_v15 = vpop.permute.xlu1 %1184  ;;  %v1868_v43 = vpack.c.bf16 %v1175_v6, %v1165_v27 }
 0x4fd   : > { %v1186_v63 = vsel %vm994_vm6, %v1183_v52, %v1185_v15  ;;  %v1187_v19 = vsel %vm994_vm6, %v1185_v15, %v1183_v52 }
 0x4fe   : > { %v1188_v11 = vmul.f32 %v1186_v63, %v2904_v5  ;;  %v1189_v23 = vmul.f32 %v1187_v19, %v2906_v49  ;;  %1869 = vmatprep.subr.bf16.mxu1 %v1868_v43  ;;  %v1876_v49 = vpack.c.bf16 %v1197_v28, %v1193_v35  ;;  %v3280_v63 = vld [vmem:[#allocation17_spill] sm:$0xff] }
 0x4ff   : > { %v492_v55 = vpop.permute.xlu0 %491  ;;  %1871 = vmatpush1.bf16.msra.mxu1 %v1870_v13 }
 0x500   : > { %v1874_v61 = vpack.c.bf16 %v1188_v11, %v1178_v62  ;;  %v639_v31 = vadd.f32 %v2776_v58, %v492_v55  ;;  %v494_v0 = vpop.permute.xlu1 %493  ;;  %v1872_v22 = vpack.c.bf16 %v1189_v23, %v1179_v7  ;;  %v1878_v58 = vpack.c.bf16 %v1196_v10, %v1192_v32  ;;  %v3281_v55 = vld [vmem:[#allocation16_spill] sm:$0xff] }
 0x501   : > { %v644_v44 = vadd.f32 %v2774_v51, %v494_v0 }
 0x502   : > { %v717_v5 = vsub.f32 0.0, %v639_v31  ;;  %1873 = vmatprep.subr.bf16.mxu1 %v1872_v22 }
 0x503   : > { %v718_v46 = vsub.f32 0.0, %v644_v44  ;;  %v496_v12 = vpop.permute.xlu0 %495  ;;  %1875 = vmatpush1.bf16.msra.mxu1 %v1874_v61 }
 0x504   : > { %v733_v53 = vmul.f32 1.442695, %v717_v5  ;;  %v649_v4 = vadd.f32 %v2780_v54, %v496_v12  ;;  %v498_v48 = vpop.permute.xlu1 %497  ;;  %1877 = vmatprep.subr.bf16.mxu1 %v1876_v49  ;;  %v1200_v54 = vmul.f32 %v2937_v14, %v1162_v18  ;;  %v3282_v5 = vld [vmem:[#allocation19_spill] sm:$0xff] }
 0x505   : > { %v735_v1 = vmul.f32 1.442695, %v718_v46  ;;  %v654_v2 = vadd.f32 %v2778_v60, %v498_v48 }
 0x506   : > { %1969 = vpow2.f32 %v733_v53  ;;  %v719_v51 = vsub.f32 0.0, %v649_v4 }
 0x507   : > { %1971 = vpow2.f32 %v735_v1  ;;  %v720_v8 = vsub.f32 0.0, %v654_v2  ;;  %v500_v17 = vpop.permute.xlu0 %499  ;;  %1879 = vmatpush1.bf16.msra.mxu1 %v1878_v58 }
 0x508   : > { %v737_v20 = vmul.f32 1.442695, %v719_v51  ;;  %v659_v9 = vadd.f32 %v2784_v59, %v500_v17  ;;  %v502_v16 = vpop.permute.xlu1 %501  ;;  %1241 = vmatprep.subr.mxu1 %v1201_v30 }
 0x509   : > { %v739_v25 = vmul.f32 1.442695, %v720_v8  ;;  %v664_v24 = vadd.f32 %v2782_v57, %v502_v16 }
 0x50a   : > { %1973 = vpow2.f32 %v737_v20  ;;  %v721_v60 = vsub.f32 0.0, %v659_v9 }
 0x50b   : > { %1975 = vpow2.f32 %v739_v25  ;;  %v722_v21 = vsub.f32 0.0, %v664_v24  ;;  %v504_v34 = vpop.permute.xlu0 %503  ;;  %1242 = vmatpush1.msra.mxu1 %v1200_v54 }
 0x50c   : > { %v741_v33 = vmul.f32 1.442695, %v721_v60  ;;  %v669_v42 = vadd.f32 %v2788_v56, %v504_v34  ;;  %v506_v41 = vpop.permute.xlu1 %505  ;;  %1689 = vmatmul.mubr.msk.f32.vlgmr.msra.gmra.mrb[18].mxu1 %vm1063_vm7, %v221_v37  ;;  %v3279_v56 = vld [vmem:[#allocation14_spill] sm:$0xff] }
 0x50d   : > { %v743_v59 = vmul.f32 1.442695, %v722_v21  ;;  %v674_v26 = vadd.f32 %v3277_v50, %v506_v41  ;;  %v3283_v37 = vld [vmem:[#allocation18_spill] sm:$0xff] }
 0x50e   : > { %1977 = vpow2.f32 %v741_v33  ;;  %v723_v14 = vsub.f32 0.0, %v669_v42  ;;  %v3284_v33 = vld [vmem:[#allocation21_spill] sm:$0xff] }
 0x50f   : > { %1979 = vpow2.f32 %v743_v59  ;;  %v724_v57 = vsub.f32 0.0, %v674_v26  ;;  %v508_v36 = vpop.permute.xlu0 %507 }
 0x510   : > { %v1970_v18 = vpop.eup %1969  ;;  %v745_v29 = vmul.f32 1.442695, %v723_v14  ;;  %v679_v39 = vadd.f32 %v3278_v3, %v508_v36  ;;  %v510_v40 = vpop.permute.xlu1 %509 }
 0x511   : > { %v1972_v45 = vpop.eup %1971  ;;  %v765_v47 = vadd.f32 1.0, %v1970_v18  ;;  %v747_v27 = vmul.f32 1.442695, %v724_v57  ;;  %v684_v38 = vadd.f32 %v3279_v56, %v510_v40 }
 0x512   : > { %v766_v6 = vadd.f32 1.0, %v1972_v45  ;;  %1981 = vpow2.f32 %v745_v29  ;;  %v725_v52 = vsub.f32 0.0, %v679_v39  ;;  %v3285_v29 = vld [vmem:[#allocation20_spill] sm:$0xff] }
 0x513   : > { %1983 = vrcp.f32 %v765_v47  ;;  %v726_v13 = vsub.f32 0.0, %v684_v38  ;;  %v512_v15 = vpop.permute.xlu0 %511 }
 0x514   : > { %v1974_v43 = vpop.eup %1973  ;;  %1985 = vrcp.f32 %v766_v6  ;;  %v749_v62 = vmul.f32 1.442695, %v725_v52  ;;  %v689_v19 = vadd.f32 %v3280_v63, %v512_v15  ;;  %v514_v28 = vpop.permute.xlu1 %513 }
 0x515   : > { %v1976_v11 = vpop.eup %1975  ;;  %v767_v23 = vadd.f32 1.0, %v1974_v43  ;;  %1987 = vpow2.f32 %v747_v27  ;;  %v751_v7 = vmul.f32 1.442695, %v726_v13  ;;  %v694_v35 = vadd.f32 %v3281_v55, %v514_v28 }
 0x516   : > { %v768_v61 = vadd.f32 1.0, %v1976_v11  ;;  %1989 = vpow2.f32 %v749_v62  ;;  %v727_v31 = vsub.f32 0.0, %v689_v19 }
 0x517   : > { %1991 = vrcp.f32 %v767_v23  ;;  %v728_v0 = vsub.f32 0.0, %v694_v35  ;;  %v516_v22 = vpop.permute.xlu0 %515 }
 0x518   : > { %v1978_v10 = vpop.eup %1977  ;;  %1993 = vrcp.f32 %v768_v61  ;;  %v753_v44 = vmul.f32 1.442695, %v727_v31  ;;  %v699_v49 = vadd.f32 %v3282_v5, %v516_v22  ;;  %v518_v1 = vpop.permute.xlu1 %517 }
 0x519   : > { %v1980_v32 = vpop.eup %1979  ;;  %v769_v46 = vadd.f32 1.0, %v1978_v10  ;;  %1995 = vpow2.f32 %v751_v7  ;;  %v755_v12 = vmul.f32 1.442695, %v728_v0  ;;  %v704_v60 = vadd.f32 %v3283_v37, %v518_v1 }
 0x51a   : > { %v770_v53 = vadd.f32 1.0, %v1980_v32  ;;  %1997 = vpow2.f32 %v753_v44  ;;  %v729_v4 = vsub.f32 0.0, %v699_v49 }
 0x51b   : > { %1999 = vrcp.f32 %v769_v46  ;;  %v520_v9 = vpop.permute.xlu0 %519  ;;  %v730_v18 = vsub.f32 0.0, %v704_v60 }
 0x51c   : > { %v1982_v48 = vpop.eup %1981  ;;  %2001 = vrcp.f32 %v770_v53  ;;  %v757_v58 = vmul.f32 1.442695, %v729_v4  ;;  %v709_v42 = vadd.f32 %v3284_v33, %v520_v9  ;;  %v522_v41 = vpop.permute.xlu1 %521 }
 0x51d   : > { %v1984_v2 = vpop.eup %1983  ;;  %v771_v30 = vadd.f32 1.0, %v1982_v48  ;;  %2003 = vpow2.f32 %v755_v12  ;;  %v714_v3 = vadd.f32 %v3285_v29, %v522_v41  ;;  %v759_v13 = vmul.f32 1.442695, %v730_v18 }
 0x51e   : > { %v1986_v51 = vpop.eup %1985  ;;  %v797_v8 = vmul.f32 1.442695, %v1984_v2  ;;  %2005 = vpow2.f32 %v757_v58  ;;  %v731_v45 = vsub.f32 0.0, %v709_v42 }
 0x51f   : > { %v1988_v17 = vpop.eup %1987  ;;  %v799_v20 = vmul.f32 1.442695, %v1986_v51  ;;  %2007 = vrcp.f32 %v771_v30  ;;  %v732_v15 = vsub.f32 0.0, %v714_v3 }
 0x520   : > { %v1990_v16 = vpop.eup %1989  ;;  %2009 = vpow2.f32 %v797_v8  ;;  %v772_v54 = vadd.f32 1.0, %v1988_v17  ;;  %v761_v63 = vmul.f32 1.442695, %v731_v45 }
 0x521   : > { %v1992_v25 = vpop.eup %1991  ;;  %2011 = vpow2.f32 %v799_v20  ;;  %v773_v24 = vadd.f32 1.0, %v1990_v16  ;;  %v763_v7 = vmul.f32 1.442695, %v732_v15 }
 0x522   : > { %v1994_v21 = vpop.eup %1993  ;;  %v801_v34 = vmul.f32 1.442695, %v1992_v25  ;;  %2013 = vrcp.f32 %v772_v54 }
 0x523   : > { %v1996_v59 = vpop.eup %1995  ;;  %v803_v50 = vmul.f32 1.442695, %v1994_v21  ;;  %2015 = vrcp.f32 %v773_v24 }
 0x524   : > { %v1998_v26 = vpop.eup %1997  ;;  %2017 = vpow2.f32 %v801_v34  ;;  %v774_v14 = vadd.f32 1.0, %v1996_v59 }
 0x525   : > { %v2000_v57 = vpop.eup %1999  ;;  %2019 = vpow2.f32 %v803_v50  ;;  %v775_v36 = vadd.f32 1.0, %v1998_v26 }
 0x526   : > { %v2002_v39 = vpop.eup %2001  ;;  %v805_v40 = vmul.f32 1.442695, %v2000_v57  ;;  %2021 = vrcp.f32 %v774_v14 }
 0x527   : > { %v2004_v47 = vpop.eup %2003  ;;  %v807_v27 = vmul.f32 1.442695, %v2002_v39  ;;  %2023 = vrcp.f32 %v775_v36 }
 0x528   : > { %v2006_v56 = vpop.eup %2005  ;;  %2025 = vpow2.f32 %v805_v40  ;;  %v776_v38 = vadd.f32 1.0, %v2004_v47 }
 0x529   : > { %v2008_v6 = vpop.eup %2007  ;;  %2027 = vpow2.f32 %v807_v27  ;;  %v777_v52 = vadd.f32 1.0, %v2006_v56 }
 0x52a   : > { %v2010_v43 = vpop.eup %2009  ;;  %v809_v62 = vmul.f32 1.442695, %v2008_v6  ;;  %2029 = vrcp.f32 %v776_v38 }
 0x52b   : > { %v2012_v19 = vpop.eup %2011  ;;  %2031 = vrcp.f32 %v777_v52  ;;  %1337 = vperm.xlu1 %1967, %v2010_v43  }
 0x52c   : > { %v2014_v28 = vpop.eup %2013  ;;  %2033 = vpow2.f32 %v809_v62  ;;  %1342 = vperm.xlu0 %1968, %v2012_v19   ;;  %v1299_v41 = vpop.permute.xlu0 %1298 }
 0x52d   : > { %v2016_v11 = vpop.eup %2015  ;;  %v811_v23 = vmul.f32 1.442695, %v2014_v28  ;;  %2035 = vpow2.f32 %v759_v13  ;;  %v1317_v39 = vpop.permute.xlu1 %1316 }
 0x52e   : > { %v2018_v55 = vpop.eup %2017  ;;  %v813_v35 = vmul.f32 1.442695, %v2016_v11  ;;  %2037 = vpow2.f32 %v761_v63 }
 0x52f   : > { %v2020_v61 = vpop.eup %2019  ;;  %2039 = vpow2.f32 %v811_v23  ;;  %1347 = vperm.xlu1 %1967, %v2018_v55  }
 0x530   : > { %v2022_v31 = vpop.eup %2021  ;;  %2041 = vpow2.f32 %v813_v35 }
 0x531   : > { %v2024_v0 = vpop.eup %2023  ;;  %v815_v22 = vmul.f32 1.442695, %v2022_v31  ;;  %2043 = vpow2.f32 %v763_v7 }
 0x532   : > { %v2026_v10 = vpop.eup %2025  ;;  %v817_v44 = vmul.f32 1.442695, %v2024_v0 }
 0x533   : > { %v2028_v5 = vpop.eup %2027  ;;  %2045 = vpow2.f32 %v815_v22  ;;  %1357 = vperm.xlu0 %1968, %v2026_v10   ;;  %1352 = vperm.xlu1 %1967, %v2020_v61  }
 0x534   : > { %v2030_v49 = vpop.eup %2029  ;;  %2047 = vpow2.f32 %v817_v44 }
 0x535   : > { %v2032_v32 = vpop.eup %2031  ;;  %v819_v46 = vmul.f32 1.442695, %v2030_v49 }
 0x536   : > { %v2034_v12 = vpop.eup %2033  ;;  %v821_v53 = vmul.f32 1.442695, %v2032_v32 }
 0x537   : > { %v2036_v4 = vpop.eup %2035  ;;  %2049 = vpow2.f32 %v819_v46  ;;  %1367 = vperm.xlu0 %1968, %v2034_v12   ;;  %1362 = vperm.xlu1 %1967, %v2028_v5  }
 0x538   : > { %v2038_v48 = vpop.eup %2037  ;;  %2051 = vpow2.f32 %v821_v53  ;;  %v778_v58 = vadd.f32 1.0, %v2036_v4 }
 0x539   : > { %v2040_v1 = vpop.eup %2039  ;;  %v779_v2 = vadd.f32 1.0, %v2038_v48 }
 0x53a   : > { %v2042_v30 = vpop.eup %2041  ;;  %2053 = vrcp.f32 %v778_v58 }
 0x53b   : > { %v2044_v51 = vpop.eup %2043  ;;  %2055 = vrcp.f32 %v779_v2  ;;  %1377 = vperm.xlu0 %1968, %v2042_v30   ;;  %1372 = vperm.xlu1 %1967, %v2040_v1   ;;  %v3286_v30 = vld [vmem:[#allocation22_spill] sm:$0xff] }
 0x53c   : > { %v780_v8 = vadd.f32 1.0, %v2044_v51 }
 0x53d   : > { %v2046_v17 = vpop.eup %2045 }
 0x53e   : > { %v2048_v20 = vpop.eup %2047  ;;  %2057 = vrcp.f32 %v780_v8 }
 0x53f   : > { %1387 = vperm.xlu0 %1968, %v2048_v20   ;;  %1382 = vperm.xlu1 %1967, %v2046_v17  }
 0x541   : > { %v2050_v9 = vpop.eup %2049 }
 0x542   : > { %v2052_v16 = vpop.eup %2051 }
 0x543   : > { %1397 = vperm.xlu0 %1968, %v2052_v16   ;;  %1392 = vperm.xlu1 %1967, %v2050_v9  }
 0x544   : > { %v2054_v54 = vpop.eup %2053 }
 0x545   : > { %v2056_v25 = vpop.eup %2055  ;;  %v823_v24 = vmul.f32 1.442695, %v2054_v54 }
 0x546   : > { %v825_v37 = vmul.f32 1.442695, %v2056_v25 }
 0x547   : > { %2059 = vpow2.f32 %v823_v24 }
 0x548   : > { %v2058_v60 = vpop.eup %2057  ;;  %2061 = vpow2.f32 %v825_v37 }
 0x549   : > { %v827_v21 = vmul.f32 1.442695, %v2058_v60 }
 0x54b   : > { %2063 = vpow2.f32 %v827_v21 }
 0x551   : > { %v2060_v34 = vpop.eup %2059 }
 0x552   : > { %v2062_v33 = vpop.eup %2061  ;;  %1402 = vperm.xlu1 %1967, %v2060_v34  }
 0x553   : > { %1407 = vperm.xlu0 %1968, %v2062_v33  }
 0x555   : > { %v2064_v42 = vpop.eup %2063 }
 0x556   : > { %1412 = vperm.xlu1 %1967, %v2064_v42  }
 0x5aa   : > { %v3041_v6 = vpop.permute.xlu1 %1337 }
 0x5ab   : > { %v3047_v23 = vpop.permute.xlu0 %1342 }
 0x5ae   : > { %v3043_v19 = vpop.permute.xlu1 %1347 }
 0x5b2   : > { %v3045_v11 = vpop.permute.xlu1 %1352  ;;  %v3049_v35 = vpop.permute.xlu0 %1357 }
 0x5b6   : > { %v3051_v61 = vpop.permute.xlu1 %1362  ;;  %v3053_v22 = vpop.permute.xlu0 %1367 }
 0x5ba   : > { %v3055_v10 = vpop.permute.xlu1 %1372  ;;  %v3057_v5 = vpop.permute.xlu0 %1377 }
 0x5be   : > { %v3059_v49 = vpop.permute.xlu1 %1382  ;;  %v3061_v53 = vpop.permute.xlu0 %1387 }
 0x5c2   : > { %v3063_v4 = vpop.permute.xlu1 %1392  ;;  %v3065_v48 = vpop.permute.xlu0 %1397 }
 0x5d1   : > { %v3067_v58 = vpop.permute.xlu1 %1402 }
 0x5d2   : > { %v3081_v60 = vpop.permute.xlu0 %1407 }
 0x5d5   : > { %v3083_v21 = vpop.permute.xlu1 %1412 }
 0x5df   : > { %v1291_v59 = vpop.f32.mrb[18].mxu1 }
 0x5e0   : > { %v1301_v50 = vmul.f32 %v1299_v41, %v1291_v59  ;;  %v1293_v26 = vpop.f32.mrb[19].mxu1 }
 0x5e1   : > { %v1302_v14 = vmul.f32 %v1299_v41, %v1293_v26 }
 0x5e2   : > { %v1303_v57 = vrot.slane %v1301_v50, 4 }
 0x5e3   : > { %v1309_v36 = vrot.slane %v1302_v14, 4 }
 0x5e4   : > { %v1304_v18 = vadd.f32 %v1303_v57, %v1301_v50 }
 0x5e5   : > { %v1310_v29 = vadd.f32 %v1309_v36, %v1302_v14 }
 0x5e6   : > { %v1305_v3 = vrot.slane %v1304_v18, 2 }
 0x5e7   : > { %v1311_v40 = vrot.slane %v1310_v29, 2 }
 0x5e8   : > { %v1306_v45 = vadd.f32 %v1305_v3, %v1304_v18 }
 0x5e9   : > { %v1312_v47 = vadd.f32 %v1311_v40, %v1310_v29 }
 0x5ea   : > { %v1307_v27 = vrot.slane %v1306_v45, 1 }
 0x5eb   : > { %v1313_v56 = vrot.slane %v1312_v47, 1 }
 0x5ec   : > { %v1308_v38 = vadd.f32 %v1307_v27, %v1306_v45 }
 0x5ed   : > { %v1314_v52 = vadd.f32 %v1313_v56, %v1312_v47 }
 0x5ee   : > { %v1319_v13 = vadd.f32 %v1317_v39, %v1308_v38 }
 0x5ef   : > { %v1320_v15 = vadd.f32 %v1317_v39, %v1314_v52 }
 0x5f0   : > { %v1321_v43 = vsub.f32 0.0, %v1319_v13 }
 0x5f1   : > { %v1322_v62 = vsub.f32 0.0, %v1320_v15 }
 0x5f2   : > { %v1323_v63 = vmul.f32 1.442695, %v1321_v43 }
 0x5f3   : > { %v1325_v28 = vmul.f32 1.442695, %v1322_v62  ;;  %v2077_v62 = vld [vmem:[%s2493_s29] sm:$0xff] }
 0x5f4   : > { %2065 = vpow2.f32 %v1323_v63 }
 0x5f5   : > { %2067 = vpow2.f32 %v1325_v28  ;;  %v2078_v28 = vld [vmem:[%s2493_s29 + $0x10] sm:$0xff] }
 0x5fe   : > { %v2066_v7 = vpop.eup %2065 }
 0x5ff   : > { %v2068_v55 = vpop.eup %2067  ;;  %v1327_v31 = vadd.f32 1.0, %v2066_v7 }
 0x600   : > { %v1328_v0 = vadd.f32 1.0, %v2068_v55  ;;  %v2079_v55 = vld [vmem:[%s2493_s29 + $0x20] sm:$0xff] }
 0x601   : > { %2069 = vrcp.f32 %v1327_v31 }
 0x602   : > { %2071 = vrcp.f32 %v1328_v0  ;;  %v2080_v0 = vld [vmem:[%s2493_s29 + $0x30] sm:$0xff] }
 0x60b   : > { %v2070_v44 = vpop.eup %2069 }
 0x60c   : > { %v2072_v32 = vpop.eup %2071  ;;  %v1331_v46 = vmul.f32 1.442695, %v2070_v44 }
 0x60d   : > { %v1333_v12 = vmul.f32 1.442695, %v2072_v32  ;;  %v2081_v32 = vld [vmem:[%s2493_s29 + $0x40] sm:$0xff] }
 0x60e   : > { %2073 = vpow2.f32 %v1331_v46 }
 0x60f   : > { %2075 = vpow2.f32 %v1333_v12  ;;  %v2082_v12 = vld [vmem:[%s2493_s29 + $0x50] sm:$0xff] }
 0x618   : > { %v2074_v1 = vpop.eup %2073 }
 0x619   : > { %v2076_v2 = vpop.eup %2075  ;;  %v1418_v51 = vrot.slane %v2074_v1, %v3286_v30 }
 0x61a   : > { %v3071_v8 = vrot.slane %v2076_v2, %v3286_v30  ;;  %v2083_v2 = vld [vmem:[%s2493_s29 + $0x60] sm:$0xff] }
 0x61b   : > { %v1423_v17 = vadd.f32 %v1418_v51, %v3041_v6  ;;  %v1425_v20 = vadd.f32 %v1418_v51, %v3047_v23  ;;  %v1427_v9 = vadd.f32 %v1418_v51, %v3043_v19  ;;  %v1429_v16 = vadd.f32 %v1418_v51, %v3045_v11 }
 0x61c   : > { %v1431_v54 = vadd.f32 %v1418_v51, %v3049_v35  ;;  %v1433_v25 = vadd.f32 %v1418_v51, %v3051_v61  ;;  %v1435_v24 = vadd.f32 %v1418_v51, %v3053_v22  ;;  %v1437_v37 = vadd.f32 %v1418_v51, %v3055_v10 }
 0x61d   : > { %v1439_v34 = vadd.f32 %v1418_v51, %v3057_v5  ;;  %v1441_v33 = vadd.f32 %v1418_v51, %v3059_v49  ;;  %v1443_v42 = vadd.f32 %v1418_v51, %v3061_v53  ;;  %v1445_v41 = vadd.f32 %v1418_v51, %v3063_v4 }
 0x61e   : > { %v1447_v59 = vadd.f32 %v1418_v51, %v3065_v48  ;;  %v1449_v50 = vadd.f32 %v1418_v51, %v3067_v58  ;;  %v1451_v26 = vadd.f32 %v1418_v51, %v3081_v60  ;;  %v1453_v14 = vadd.f32 %v1418_v51, %v3083_v21  ;;  %v2084_v51 = vld [vmem:[%s2493_s29 + $0x70] sm:$0xff] }
 0x61f   : > { %v1455_v57 = vadd.f32 1.0, %v1423_v17  ;;  %v1457_v36 = vadd.f32 1.0, %v1425_v20  ;;  %v1459_v18 = vadd.f32 1.0, %v1427_v9  ;;  %v1461_v29 = vadd.f32 1.0, %v1429_v16  ;;  %v2085_v20 = vld [vmem:[%s2493_s29 + $0x80] sm:$0xff]  ;;  %v2086_v16 = vld [vmem:[%s2493_s29 + $0x90] sm:$0xff] }
 0x620   : > { %v1463_v3 = vadd.f32 1.0, %v1431_v54  ;;  %v1465_v39 = vadd.f32 1.0, %v1433_v25  ;;  %v1467_v40 = vadd.f32 1.0, %v1435_v24  ;;  %v1469_v45 = vadd.f32 1.0, %v1437_v37  ;;  %v2087_v25 = vld [vmem:[%s2493_s29 + $0xa0] sm:$0xff]  ;;  %v2088_v37 = vld [vmem:[%s2493_s29 + $0xb0] sm:$0xff] }
 0x621   : > { %v1471_v47 = vadd.f32 1.0, %v1439_v34  ;;  %v1473_v27 = vadd.f32 1.0, %v1441_v33  ;;  %v1475_v56 = vadd.f32 1.0, %v1443_v42  ;;  %v1477_v38 = vadd.f32 1.0, %v1445_v41  ;;  %v2089_v33 = vld [vmem:[%s2493_s29 + $0xc0] sm:$0xff]  ;;  %v2090_v41 = vld [vmem:[%s2493_s29 + $0xd0] sm:$0xff] }
 0x622   : > { %v1479_v52 = vadd.f32 1.0, %v1447_v59  ;;  %v1481_v13 = vadd.f32 1.0, %v1449_v50  ;;  %v1483_v15 = vadd.f32 1.0, %v1451_v26  ;;  %v1485_v43 = vadd.f32 1.0, %v1453_v14  ;;  %v2091_v50 = vld [vmem:[%s2493_s29 + $0xe0] sm:$0xff]  ;;  %v2092_v14 = vld [vmem:[%s2493_s29 + $0xf0] sm:$0xff] }
 0x623   : > { %v1487_v63 = vmul.f32 %v2077_v62, %v1455_v57  ;;  %v1489_v7 = vmul.f32 %v2078_v28, %v1457_v36  ;;  %v1491_v31 = vmul.f32 %v2079_v55, %v1459_v18  ;;  %v1493_v44 = vmul.f32 %v2080_v0, %v1461_v29  ;;  %v2093_v62 = vld [vmem:[%s2493_s29 + $0x8] sm:$0xff]  ;;  %v2094_v28 = vld [vmem:[%s2493_s29 + $0x18] sm:$0xff] }
 0x624   : > { %v1495_v46 = vmul.f32 %v2081_v32, %v1463_v3  ;;  %v1497_v1 = vmul.f32 %v2082_v12, %v1465_v39  ;;  %v1499_v30 = vmul.f32 %v2083_v2, %v1467_v40  ;;  %v1501_v17 = vmul.f32 %v2084_v51, %v1469_v45  ;;  %v2095_v55 = vld [vmem:[%s2493_s29 + $0x28] sm:$0xff]  ;;  %v2096_v0 = vld [vmem:[%s2493_s29 + $0x38] sm:$0xff] }
 0x625   : > { %v1503_v9 = vmul.f32 %v2085_v20, %v1471_v47  ;;  %v1505_v54 = vmul.f32 %v2086_v16, %v1473_v27  ;;  %v1507_v24 = vmul.f32 %v2087_v25, %v1475_v56  ;;  %v1509_v34 = vmul.f32 %v2088_v37, %v1477_v38  ;;  %1519 = vst [vmem:[%s3107_s30] sm:$0xff] %v1487_v63  ;;  %v2097_v32 = vld [vmem:[%s2493_s29 + $0x48] sm:$0xff]  ;;  %v2098_v12 = vld [vmem:[%s2493_s29 + $0x58] sm:$0xff] }
 0x626   : > { %1521 = vst [vmem:[%s3107_s30 + $0x10] sm:$0xff] %v1489_v7  ;;  %1523 = vst [vmem:[%s3107_s30 + $0x20] sm:$0xff] %v1491_v31  ;;  %v1511_v42 = vmul.f32 %v2089_v33, %v1479_v52  ;;  %v1513_v59 = vmul.f32 %v2090_v41, %v1481_v13  ;;  %v1515_v26 = vmul.f32 %v2091_v50, %v1483_v15  ;;  %v2099_v2 = vld [vmem:[%s2493_s29 + $0x68] sm:$0xff]  ;;  %v2100_v51 = vld [vmem:[%s2493_s29 + $0x78] sm:$0xff] }
 0x627   : > { %1525 = vst [vmem:[%s3107_s30 + $0x30] sm:$0xff] %v1493_v44  ;;  %v1517_v57 = vmul.f32 %v2092_v14, %v1485_v43  ;;  %1527 = vst [vmem:[%s3107_s30 + $0x40] sm:$0xff] %v1495_v46  ;;  %v1424_v36 = vadd.f32 %v3071_v8, %v3041_v6  ;;  %v1426_v18 = vadd.f32 %v3071_v8, %v3047_v23  ;;  %v2101_v20 = vld [vmem:[%s2493_s29 + $0x88] sm:$0xff]  ;;  %v2102_v16 = vld [vmem:[%s2493_s29 + $0x98] sm:$0xff] }
 0x628   : > { %1529 = vst [vmem:[%s3107_s30 + $0x50] sm:$0xff] %v1497_v1  ;;  %1531 = vst [vmem:[%s3107_s30 + $0x60] sm:$0xff] %v1499_v30  ;;  %v1428_v29 = vadd.f32 %v3071_v8, %v3043_v19  ;;  %v1430_v3 = vadd.f32 %v3071_v8, %v3045_v11  ;;  %v1432_v39 = vadd.f32 %v3071_v8, %v3049_v35  ;;  %v2103_v25 = vld [vmem:[%s2493_s29 + $0xa8] sm:$0xff]  ;;  %v2104_v37 = vld [vmem:[%s2493_s29 + $0xb8] sm:$0xff] }
 0x629   : > { %1533 = vst [vmem:[%s3107_s30 + $0x70] sm:$0xff] %v1501_v17  ;;  %1535 = vst [vmem:[%s3107_s30 + $0x80] sm:$0xff] %v1503_v9  ;;  %v1434_v40 = vadd.f32 %v3071_v8, %v3051_v61  ;;  %v1436_v6 = vadd.f32 %v3071_v8, %v3053_v22  ;;  %v1438_v23 = vadd.f32 %v3071_v8, %v3055_v10  ;;  %v1456_v47 = vadd.f32 1.0, %v1424_v36  ;;  %v2105_v33 = vld [vmem:[%s2493_s29 + $0xc8] sm:$0xff]  ;;  %v2106_v41 = vld [vmem:[%s2493_s29 + $0xd8] sm:$0xff] }
 0x62a   : > { %1537 = vst [vmem:[%s3107_s30 + $0x90] sm:$0xff] %v1505_v54  ;;  %1539 = vst [vmem:[%s3107_s30 + $0xa0] sm:$0xff] %v1507_v24  ;;  %v1440_v19 = vadd.f32 %v3071_v8, %v3057_v5  ;;  %v1442_v11 = vadd.f32 %v3071_v8, %v3059_v49  ;;  %v1444_v45 = vadd.f32 %v3071_v8, %v3061_v53  ;;  %v1458_v49 = vadd.f32 1.0, %v1426_v18  ;;  %v2107_v50 = vld [vmem:[%s2493_s29 + $0xe8] sm:$0xff]  ;;  %v2108_v14 = vld [vmem:[%s2493_s29 + $0xf8] sm:$0xff] }
 0x62b   : > { %1541 = vst [vmem:[%s3107_s30 + $0xb0] sm:$0xff] %v1509_v34  ;;  %1543 = vst [vmem:[%s3107_s30 + $0xc0] sm:$0xff] %v1511_v42  ;;  %v1446_v35 = vadd.f32 %v3071_v8, %v3063_v4  ;;  %v1448_v61 = vadd.f32 %v3071_v8, %v3065_v48  ;;  %v1450_v22 = vadd.f32 %v3071_v8, %v3067_v58  ;;  %v1460_v53 = vadd.f32 1.0, %v1428_v29 }
 0x62c   : > { %1545 = vst [vmem:[%s3107_s30 + $0xd0] sm:$0xff] %v1513_v59  ;;  %1547 = vst [vmem:[%s3107_s30 + $0xe0] sm:$0xff] %v1515_v26  ;;  %v1452_v10 = vadd.f32 %v3071_v8, %v3081_v60  ;;  %v1454_v5 = vadd.f32 %v3071_v8, %v3083_v21  ;;  %v1462_v27 = vadd.f32 1.0, %v1430_v3  ;;  %v1464_v4 = vadd.f32 1.0, %v1432_v39 }
 0x62d   : > { %1549 = vst [vmem:[%s3107_s30 + $0xf0] sm:$0xff] %v1517_v57  ;;  %v1466_v56 = vadd.f32 1.0, %v1434_v40  ;;  %v1468_v48 = vadd.f32 1.0, %v1436_v6  ;;  %v1470_v38 = vadd.f32 1.0, %v1438_v23  ;;  %v1472_v58 = vadd.f32 1.0, %v1440_v19 }
 0x62e   : > { %v1474_v52 = vadd.f32 1.0, %v1442_v11  ;;  %v1476_v60 = vadd.f32 1.0, %v1444_v45  ;;  %v1478_v13 = vadd.f32 1.0, %v1446_v35  ;;  %v1480_v8 = vadd.f32 1.0, %v1448_v61 }
 0x62f   : > { %v1482_v21 = vadd.f32 1.0, %v1450_v22  ;;  %v1484_v15 = vadd.f32 1.0, %v1452_v10  ;;  %v1486_v43 = vadd.f32 1.0, %v1454_v5  ;;  %v1488_v63 = vmul.f32 %v2093_v62, %v1456_v47 }
 0x630   : > { %v1490_v7 = vmul.f32 %v2094_v28, %v1458_v49  ;;  %v1492_v31 = vmul.f32 %v2095_v55, %v1460_v53  ;;  %v1494_v44 = vmul.f32 %v2096_v0, %v1462_v27  ;;  %v1496_v46 = vmul.f32 %v2097_v32, %v1464_v4 }
 0x631   : > { %v1498_v1 = vmul.f32 %v2098_v12, %v1466_v56  ;;  %v1500_v30 = vmul.f32 %v2099_v2, %v1468_v48  ;;  %v1502_v17 = vmul.f32 %v2100_v51, %v1470_v38  ;;  %v1504_v9 = vmul.f32 %v2101_v20, %v1472_v58  ;;  %1520 = vst [vmem:[%s3107_s30 + $0x8] sm:$0xff] %v1488_v63 }
 0x632   : > { %v1506_v54 = vmul.f32 %v2102_v16, %v1474_v52  ;;  %v1508_v24 = vmul.f32 %v2103_v25, %v1476_v60  ;;  %v1510_v34 = vmul.f32 %v2104_v37, %v1478_v13  ;;  %1522 = vst [vmem:[%s3107_s30 + $0x18] sm:$0xff] %v1490_v7  ;;  %1524 = vst [vmem:[%s3107_s30 + $0x28] sm:$0xff] %v1492_v31 }
 0x633   : > { %1526 = vst [vmem:[%s3107_s30 + $0x38] sm:$0xff] %v1494_v44  ;;  %v1512_v42 = vmul.f32 %v2105_v33, %v1480_v8  ;;  %v1514_v59 = vmul.f32 %v2106_v41, %v1482_v21  ;;  %v1516_v26 = vmul.f32 %v2107_v50, %v1484_v15  ;;  %v1518_v57 = vmul.f32 %v2108_v14, %v1486_v43 }
 0x634   : > { %1528 = vst [vmem:[%s3107_s30 + $0x48] sm:$0xff] %v1496_v46  ;;  %1530 = vst [vmem:[%s3107_s30 + $0x58] sm:$0xff] %v1498_v1 }
 0x635   : > { %1532 = vst [vmem:[%s3107_s30 + $0x68] sm:$0xff] %v1500_v30  ;;  %1534 = vst [vmem:[%s3107_s30 + $0x78] sm:$0xff] %v1502_v17 }
 0x636   : > { %1536 = vst [vmem:[%s3107_s30 + $0x88] sm:$0xff] %v1504_v9  ;;  %1538 = vst [vmem:[%s3107_s30 + $0x98] sm:$0xff] %v1506_v54 }
 0x637   : > { %1540 = vst [vmem:[%s3107_s30 + $0xa8] sm:$0xff] %v1508_v24  ;;  %1542 = vst [vmem:[%s3107_s30 + $0xb8] sm:$0xff] %v1510_v34 }
 0x638   : > { %1544 = vst [vmem:[%s3107_s30 + $0xc8] sm:$0xff] %v1512_v42  ;;  %1546 = vst [vmem:[%s3107_s30 + $0xd8] sm:$0xff] %v1514_v59 }
 0x639   : > { %1548 = vst [vmem:[%s3107_s30 + $0xe8] sm:$0xff] %v1516_v26  ;;  %1550 = vst [vmem:[%s3107_s30 + $0xf8] sm:$0xff] %v1518_v57 }
 0x63a   : > { %2208 = shalt.err (!%p2205_p1)
}
 0x63b   : > { %s2209_s29 = scalar_lea.hbm %s3184_s24, 4096  ;;  %s2213_s7 = scalar_lea.hbm %s3251_s3, 8192 }
 0x63c   : > { %p2210_p13 = scmp.ne.s32.totalorder %s3184_s24, %s2209_s29  ;;  %p2214_p4 = scmp.lt.u32.totalorder %s3184_s24, %s3251_s3 }
 0x63d   : > { %p2215_p7 = scmp.lt.u32.totalorder %s2213_s7, %s2209_s29  ;;  %p2217_p11 = scmp.lt.u32.totalorder %s2209_s29, %s3184_s24 }
 0x63e   : > { %p2211_p6 = pnand %p2210_p13, %p3287_p0 }
 0x63f   : > { %p2216_p8 = por %p2215_p7, %p2214_p4 }
 0x640   : > { %p2212_p10 = pneg %p2211_p6 }
 0x641   : > { %p2218_p2 = por %p2217_p11, %p2216_p8 }
 0x643   : > { %p2219_p3 = pnand %p2218_p2, %p2212_p10 }
 0x645   : > { %2222 = shalt.err (!%p2219_p3)
}
 0x646   : > { %s2287_s22 = smov 256   ;;  %s2288_s30 = smov 16  }
 0x647   : > { %1890 = dma.vmem_to_hbm [thread:$0]  (%p3287_p0), %s3188_s21, 4096, %s3184_s24, %s1552_s16, %s2287_s22, %s2287_s22, %s2288_s30  }
 0x648 PF: > { %s1580_s10 = sand.u32 1, %s2253_s12   ;;  %p3288_p5 = scmp.ne.s32.totalorder %s3258_s19, 0 }
 0x649   : > { %p3289_p9 = scmp.ge.s32.totalorder %s2265_s15, 2  ;;  %s1581_s25 = scalar_lea.sflag [#allocation5], %s1580_s10 }
 0x64b   : > { %p1904_p12 = pnand %p3289_p9, %p3288_p5 }
 0x64d   : > { %2248 = dma.done.wait (!%p1904_p12), %s1581_s25, 4096  }
 0x64e   : > { %2250 = vsyncadd (!%p1904_p12), %s1581_s25, 4294963200  ;;  %p17_p1 = scmp.ge.s32.totalorder %s2422_s6, 4   ;;  %s3290_s12 = smov %s2257_s13 }
 0x64f   : > { %s3291_s13 = smov %s2261_s14  ;;  %s3292_s14 = smov %s2431_s11 }
 0x650   : > { %s3293_s15 = smov %s2422_s6  ;;  %19 = sbr.rel (!%p17_p1) target bundleno = 6 (0x6), region = 85 }
 0x657   :  { %1586 = vsyncpa [#allocation4], 1 }
 0x658   :  { %1588 = vsyncpa [#allocation4 + $0x1], 1 }
 0x659   :  { %1589 = vsyncpa [#allocation7], 1 }
 0x65a   :  { %1590 = vsyncpa [#allocation5], 1 }
 0x65b   :  { %1592 = vsyncpa [#allocation5 + $0x1], 1 }

</bundles_post_ra>
